<compile_context>
chip_gen: v5e
topology: v5e:2x2
jax: 0.10.0
libtpu: 0.0.40
codegen_flags: <defaults>
</compile_context>

<pallas_src>
import math
import functools

import jax
import jax.numpy as jnp
from jax.experimental import pallas as pl
from jax.experimental.pallas import tpu as pltpu

NEG_INF = -1e9
LN_EPS = 1e-5


# ----------------------------------------------------------------------------
# Pallas kernel: one (batch element, layer) step of the stacked decoder
# ----------------------------------------------------------------------------
def decoder_stack_kernel(
    x0_ref, ck_ref, cv_ref, dec_bias_ref, enc_bias_ref,
    w_qkv_ref, b_qkv_ref, wo_s_ref, bo_s_ref,
    w_qc_ref, b_qc_ref, wo_c_ref, bo_c_ref,
    fc1_w_ref, fc1_b_ref, fc2_w_ref, fc2_b_ref,
    ln_g_ref, ln_b_ref,
    y_ref,
    x_scr, q_scr, k_scr, v_scr, ctx_scr,
    *, num_heads,
):
    layer = pl.program_id(1)

    # Residual stream is carried in VMEM across the (inner, 'arbitrary') layer axis.
    @pl.when(layer == 0)
    def _():
        x_scr[...] = x0_ref[0]

    x = x_scr[...]                  # (L, E) f32
    dec_bias = dec_bias_ref[0]      # (1, L) additive key bias (self-attn padding)
    enc_bias = enc_bias_ref[0]      # (1, S) additive key bias (cross-attn padding)

    E = x.shape[-1]
    H = num_heads
    Dh = E // H

    ln_g = ln_g_ref[0]              # (3, E)
    ln_b = ln_b_ref[0]              # (3, E)

    def layer_norm(v, idx):
        mu = jnp.mean(v, axis=-1, keepdims=True)
        var = jnp.mean((v - mu) ** 2, axis=-1, keepdims=True)
        return (v - mu) * jax.lax.rsqrt(var + LN_EPS) * ln_g[idx] + ln_b[idx]

    def attend(k_heads, v_heads, key_bias, wo, b_o):
        # q_scr holds queries (scale folded into the projection), head-major (H, L, Dh) bf16.
        s = jnp.einsum('hld,hkd->hlk', q_scr[...], k_heads,
                       preferred_element_type=jnp.float32)          # (H, L, K) f32
        s = s + key_bias                                             # (1, K) broadcasts
        s = s - jnp.max(s, axis=-1, keepdims=True)
        p = jnp.exp(s)
        p = p * pl.reciprocal(jnp.sum(p, axis=-1, keepdims=True), approx=True)
        ctx = jnp.einsum('hlk,hkd->hld', p.astype(jnp.bfloat16), v_heads,
                         preferred_element_type=jnp.float32)         # (H, L, Dh) f32
        # Stage heads back to the standard concat layout (L, E), then ONE full-depth
        # out-projection matmul (contraction depth E, no (H, L, E) intermediate, no H-way sum).
        for h in range(H):
            ctx_scr[:, h * Dh:(h + 1) * Dh] = ctx[h].astype(jnp.bfloat16)
        out = jnp.dot(ctx_scr[...], wo, preferred_element_type=jnp.float32)
        return out + b_o                                             # (L, E) f32

    # --- self attention (no attn_mask: self_attn_policy='none') ----------------
    xb = x.astype(jnp.bfloat16)
    qkv = jnp.dot(xb, w_qkv_ref[0], preferred_element_type=jnp.float32) + b_qkv_ref[0]
    for h in range(H):  # pure bf16 staging into head-major layout (scale already folded in)
        q_scr[h] = qkv[:, h * Dh:(h + 1) * Dh].astype(jnp.bfloat16)
        k_scr[h] = qkv[:, E + h * Dh:E + (h + 1) * Dh].astype(jnp.bfloat16)
        v_scr[h] = qkv[:, 2 * E + h * Dh:2 * E + (h + 1) * Dh].astype(jnp.bfloat16)
    sa = attend(k_scr[...], v_scr[...], dec_bias, wo_s_ref[0], bo_s_ref[0])
    x1 = layer_norm(x + sa, 0)

    # --- cross attention (K/V pre-projected outside, fed head-major bf16) ------
    qc = jnp.dot(x1.astype(jnp.bfloat16), w_qc_ref[0],
                 preferred_element_type=jnp.float32) + b_qc_ref[0]
    for h in range(H):
        q_scr[h] = qc[:, h * Dh:(h + 1) * Dh].astype(jnp.bfloat16)
    ca = attend(ck_ref[0, 0], cv_ref[0, 0], enc_bias, wo_c_ref[0], bo_c_ref[0])
    x2 = layer_norm(x1 + ca, 1)

    # --- feed-forward (relu) ----------------------------------------------------
    h1 = jnp.dot(x2.astype(jnp.bfloat16), fc1_w_ref[0],
                 preferred_element_type=jnp.float32) + fc1_b_ref[0]
    h1 = jnp.maximum(h1, 0.0)
    ff = jnp.dot(h1.astype(jnp.bfloat16), fc2_w_ref[0],
                 preferred_element_type=jnp.float32) + fc2_b_ref[0]
    x3 = layer_norm(x2 + ff, 2)

    x_scr[...] = x3          # carry residual to the next layer step
    y_ref[0, 0] = x3         # inner_states[layer, b]


def decoder_stack(x, k_c, v_c, dec_bias, enc_bias, p, *, num_heads):
    """Run all decoder layers in one pallas_call. Returns (n_layers, B, L, E) inner states."""
    B, L, E = x.shape
    NL, _, H, S, Dh = k_c.shape
    F = p["fc1_w"].shape[2]

    # All stacked weights/biases/LN params are rank-3 (n_layers, d1, d2): stream by layer id
    # so the pipeline prefetches layer l+1's weights while layer l computes.
    def wspec(arr):
        return pl.BlockSpec((1,) + arr.shape[1:], lambda b, l: (l, 0, 0))

    in_specs = [
        pl.BlockSpec((1, L, E), lambda b, l: (b, 0, 0)),               # x0 (f32)
        pl.BlockSpec((1, 1, H, S, Dh), lambda b, l: (l, b, 0, 0, 0)),  # cross K (bf16)
        pl.BlockSpec((1, 1, H, S, Dh), lambda b, l: (l, b, 0, 0, 0)),  # cross V (bf16)
        pl.BlockSpec((1, 1, L), lambda b, l: (b, 0, 0)),               # dec key bias
        pl.BlockSpec((1, 1, S), lambda b, l: (b, 0, 0)),               # enc key bias
        wspec(p["w_qkv_s"]), wspec(p["b_qkv_s"]),
        wspec(p["w_o_s"]), wspec(p["b_o_s"]),
        wspec(p["w_q_c"]), wspec(p["b_q_c"]),
        wspec(p["w_o_c"]), wspec(p["b_o_c"]),
        wspec(p["fc1_w"]), wspec(p["fc1_b"]),
        wspec(p["fc2_w"]), wspec(p["fc2_b"]),
        wspec(p["ln_g"]), wspec(p["ln_b"]),
    ]
    return pl.pallas_call(
        functools.partial(decoder_stack_kernel, num_heads=num_heads),
        out_shape=jax.ShapeDtypeStruct((NL, B, L, E), jnp.float32),
        grid=(B, NL),
        in_specs=in_specs,
        out_specs=pl.BlockSpec((1, 1, L, E), lambda b, l: (l, b, 0, 0)),
        scratch_shapes=[
            pltpu.VMEM((L, E), jnp.float32),        # residual stream (carried across layers)
            pltpu.VMEM((H, L, Dh), jnp.bfloat16),   # staged queries
            pltpu.VMEM((H, L, Dh), jnp.bfloat16),   # staged self-attn keys
            pltpu.VMEM((H, L, Dh), jnp.bfloat16),   # staged self-attn values
            pltpu.VMEM((L, E), jnp.bfloat16),       # per-head context concat -> out-proj input
        ],
        compiler_params=pltpu.CompilerParams(
            dimension_semantics=("parallel", "arbitrary"),
            # TODO(synk): re-derive per generation (<= ~56 MiB usable on v7x's 64 MiB VMEM).
            vmem_limit_bytes=48 * 1024 * 1024,
        ),
    )(
        x, k_c, v_c, dec_bias, enc_bias,
        p["w_qkv_s"], p["b_qkv_s"], p["w_o_s"], p["b_o_s"],
        p["w_q_c"], p["b_q_c"], p["w_o_c"], p["b_o_c"],
        p["fc1_w"], p["fc1_b"], p["fc2_w"], p["fc2_b"],
        p["ln_g"], p["ln_b"],
    )


# ----------------------------------------------------------------------------
# Glue: cross K/V pre-projection for ALL layers (one batched XLA einsum)
# ----------------------------------------------------------------------------
def cross_kv_all(enc, w_kv_all, b_kv_all, num_heads):
    B, S, E = enc.shape
    NL = w_kv_all.shape[0]
    Dh = E // num_heads
    kv = jnp.einsum('bse,lef->lbsf', enc.astype(jnp.bfloat16), w_kv_all,
                    preferred_element_type=jnp.float32)               # (NL, B, S, 2E)
    kv = kv + b_kv_all[:, None, :, :]
    kv = kv.reshape(NL, B, S, 2, num_heads, Dh)
    k = jnp.transpose(kv[:, :, :, 0], (0, 1, 3, 2, 4)).astype(jnp.bfloat16)  # (NL,B,H,S,Dh)
    v = jnp.transpose(kv[:, :, :, 1], (0, 1, 3, 2, 4)).astype(jnp.bfloat16)
    return k, v


# ----------------------------------------------------------------------------
# Parameter construction + preparation (stack layers, cast bf16, fold attn scale)
# ----------------------------------------------------------------------------
def init_params(key, vocab_size, embed_dim, ffn_dim, num_layers, max_seq_length,
                padding_idx):
    keys = jax.random.split(key, 2 + 7 * num_layers)
    ki = iter(keys)

    def nrm(k, shape, s=0.05):
        return jax.random.normal(k, shape, jnp.float32) * s

    tok_table = nrm(next(ki), (vocab_size, embed_dim)).at[padding_idx].set(0.0)
    pos_table = nrm(next(ki), (max_seq_length + padding_idx + 1, embed_dim)
                    ).at[padding_idx].set(0.0)

    layers = []
    for _ in range(num_layers):
        E, F = embed_dim, ffn_dim
        layers.append({
            "w_qkv_s": nrm(next(ki), (E, 3 * E)),
            "b_qkv_s": jnp.zeros((1, 3 * E), jnp.float32),
            "w_o_s": nrm(next(ki), (E, E)),
            "b_o_s": jnp.zeros((1, E), jnp.float32),
            "w_q_c": nrm(next(ki), (E, E)),
            "b_q_c": jnp.zeros((1, E), jnp.float32),
            "w_kv_c": nrm(next(ki), (E, 2 * E)),
            "b_kv_c": jnp.zeros((1, 2 * E), jnp.float32),
            "w_o_c": nrm(next(ki), (E, E)),
            "b_o_c": jnp.zeros((1, E), jnp.float32),
            "fc1_w": nrm(next(ki), (E, F)),
            "fc1_b": jnp.zeros((1, F), jnp.float32),
            "fc2_w": nrm(next(ki), (F, E)),
            "fc2_b": jnp.zeros((1, E), jnp.float32),
            "ln_g": jnp.ones((3, E), jnp.float32),
            "ln_b": jnp.zeros((3, E), jnp.float32),
        })
    return tok_table, pos_table, layers


def prepare_params(layers, num_heads):
    """Stack per-layer params, cast matmul weights to bf16, fold 1/sqrt(Dh) into Q projs."""
    E = layers[0]["w_o_s"].shape[0]
    Dh = E // num_heads
    scale = 1.0 / math.sqrt(Dh)

    def stack(name):
        return jnp.stack([p[name] for p in layers])

    bf = lambda a: a.astype(jnp.bfloat16)

    # fold attention scale into the Q columns of the fused QKV projection (+ bias)
    q_scale = jnp.concatenate([jnp.full((E,), scale, jnp.float32),
                               jnp.ones((2 * E,), jnp.float32)])
    w_qkv = stack("w_qkv_s") * q_scale[None, None, :]
    b_qkv = stack("b_qkv_s") * q_scale[None, None, :]

    return {
        "w_qkv_s": bf(w_qkv), "b_qkv_s": b_qkv,
        "w_o_s": bf(stack("w_o_s")), "b_o_s": stack("b_o_s"),
        "w_q_c": bf(stack("w_q_c") * scale), "b_q_c": stack("b_q_c") * scale,
        "w_kv_c": bf(stack("w_kv_c")), "b_kv_c": stack("b_kv_c"),
        "w_o_c": bf(stack("w_o_c")), "b_o_c": stack("b_o_c"),
        "fc1_w": bf(stack("fc1_w")), "fc1_b": stack("fc1_b"),
        "fc2_w": bf(stack("fc2_w")), "fc2_b": stack("fc2_b"),
        "ln_g": stack("ln_g"), "ln_b": stack("ln_b"),
    }


# ----------------------------------------------------------------------------
# Full forward
# ----------------------------------------------------------------------------
def transformer_decoder_forward(tokens, encoder_out, encoder_padding_mask,
                                tok_table, pos_table, params,
                                *, padding_idx, num_heads):
    B, L = tokens.shape
    E = tok_table.shape[1]
    S = encoder_out.shape[1]
    NL = params["w_qkv_s"].shape[0]
    embed_scale = math.sqrt(E)

    dec_pad = tokens == padding_idx                                   # (B, L) bool
    keep = (1.0 - dec_pad.astype(jnp.float32))[:, :, None]

    # fairseq-style learned positions: cumsum over non-pad, pads map to padding_idx
    nonpad = (~dec_pad).astype(jnp.int32)
    positions = jnp.cumsum(nonpad, axis=1) * nonpad + padding_idx

    # Embedding combine left to XLA (gathers + scale + pad mask fuse cheaply).
    x = (tok_table[tokens] * embed_scale + pos_table[positions]) * keep   # (B, L, E) f32

    dec_bias = jnp.where(dec_pad, NEG_INF, 0.0).astype(jnp.float32).reshape(B, 1, L)
    if encoder_padding_mask is None:
        enc_bias = jnp.zeros((B, 1, S), jnp.float32)
    else:
        enc_bias = jnp.where(encoder_padding_mask, NEG_INF, 0.0).astype(
            jnp.float32).reshape(B, 1, S)

    # Cross-attention K/V for all layers in one batched matmul (hoisted out of the layer loop).
    k_c, v_c = cross_kv_all(encoder_out, params["w_kv_c"], params["b_kv_c"], num_heads)

    # TODO(synk): self_attn_policy other than 'none' (e.g. causal) not implemented.
    all_states = decoder_stack(x, k_c, v_c, dec_bias, enc_bias, params,
                               num_heads=num_heads)                   # (NL, B, L, E)

    # Transposes to fairseq's (L, B, E) layout deferred to the very end.
    inner_states = [jnp.transpose(all_states[l], (1, 0, 2)) for l in range(NL)]
    return inner_states[-1], inner_states


# ----------------------------------------------------------------------------
# Demo
# ----------------------------------------------------------------------------
if __name__ == "__main__":
    VOCAB = 50
    EMBED = 32
    HEADS = 4
    FFN = 64
    LAYERS = 2
    MAX_LEN = 16
    PAD = 0
    B, L, S = 2, 8, 12

    key = jax.random.PRNGKey(0)
    k_tok, k_enc, k_par = jax.random.split(key, 3)

    tokens = jax.random.randint(k_tok, (B, L), 1, VOCAB).astype(jnp.int32)
    tokens = tokens.at[1, -2:].set(PAD)                               # trailing padding

    encoder_out = jax.random.normal(k_enc, (B, S, EMBED), jnp.float32)
    encoder_padding_mask = jnp.zeros((B, S), jnp.bool_).at[1, -3:].set(True)

    tok_table, pos_table, layers_f32 = init_params(
        k_par, VOCAB, EMBED, FFN, LAYERS, MAX_LEN, PAD)
    params = prepare_params(layers_f32, HEADS)

    fwd = jax.jit(functools.partial(transformer_decoder_forward,
                                    padding_idx=PAD, num_heads=HEADS))
    x_out, inner_states = fwd(tokens, encoder_out, encoder_padding_mask,
                              tok_table, pos_table, params)

    x_out = jax.block_until_ready(x_out)
    for s in inner_states:
        jax.block_until_ready(s)

    assert x_out.shape == (L, B, EMBED)
    assert len(inner_states) == LAYERS
    assert bool(jnp.all(jnp.isfinite(x_out)))
    print("KERNEL_OK")
</pallas_src>

<mosaic_0001>
module attributes {stable_mosaic.version = 11 : i64} {
  func.func @decoder_stack_kernel(%arg0: i32, %arg1: i32, %arg2: memref<1x8x32xf32, #tpu.memory_space<vmem>>, %arg3: memref<1x1x4x12x8xbf16, #tpu.memory_space<vmem>>, %arg4: memref<1x1x4x12x8xbf16, #tpu.memory_space<vmem>>, %arg5: memref<1x1x8xf32, #tpu.memory_space<vmem>>, %arg6: memref<1x1x12xf32, #tpu.memory_space<vmem>>, %arg7: memref<1x32x96xbf16, #tpu.memory_space<vmem>>, %arg8: memref<1x1x96xf32, #tpu.memory_space<vmem>>, %arg9: memref<1x32x32xbf16, #tpu.memory_space<vmem>>, %arg10: memref<1x1x32xf32, #tpu.memory_space<vmem>>, %arg11: memref<1x32x32xbf16, #tpu.memory_space<vmem>>, %arg12: memref<1x1x32xf32, #tpu.memory_space<vmem>>, %arg13: memref<1x32x32xbf16, #tpu.memory_space<vmem>>, %arg14: memref<1x1x32xf32, #tpu.memory_space<vmem>>, %arg15: memref<1x32x64xbf16, #tpu.memory_space<vmem>>, %arg16: memref<1x1x64xf32, #tpu.memory_space<vmem>>, %arg17: memref<1x64x32xbf16, #tpu.memory_space<vmem>>, %arg18: memref<1x1x32xf32, #tpu.memory_space<vmem>>, %arg19: memref<1x3x32xf32, #tpu.memory_space<vmem>>, %arg20: memref<1x3x32xf32, #tpu.memory_space<vmem>>, %arg21: memref<1x1x8x32xf32, #tpu.memory_space<vmem>>, %arg22: memref<8x32xf32, #tpu.memory_space<vmem>>, %arg23: memref<4x8x8xbf16, #tpu.memory_space<vmem>>, %arg24: memref<4x8x8xbf16, #tpu.memory_space<vmem>>, %arg25: memref<4x8x8xbf16, #tpu.memory_space<vmem>>, %arg26: memref<8x32xbf16, #tpu.memory_space<vmem>>) attributes {dimension_semantics = [#tpu.dimension_semantics<parallel>, #tpu.dimension_semantics<arbitrary>], iteration_bounds = array<i64: 2, 2>, scalar_prefetch = 0 : i64, scratch_operands = 5 : i64, tpu.core_type = #tpu.core_type<tc>, window_params = [{transform_indices = @transform_0, window_bounds = array<i64: 1, 8, 32>}, {transform_indices = @transform_1, window_bounds = array<i64: 1, 1, 4, 12, 8>}, {transform_indices = @transform_2, window_bounds = array<i64: 1, 1, 4, 12, 8>}, {transform_indices = @transform_3, window_bounds = array<i64: 1, 1, 8>}, {transform_indices = @transform_4, window_bounds = array<i64: 1, 1, 12>}, {transform_indices = @transform_5, window_bounds = array<i64: 1, 32, 96>}, {transform_indices = @transform_6, window_bounds = array<i64: 1, 1, 96>}, {transform_indices = @transform_7, window_bounds = array<i64: 1, 32, 32>}, {transform_indices = @transform_8, window_bounds = array<i64: 1, 1, 32>}, {transform_indices = @transform_9, window_bounds = array<i64: 1, 32, 32>}, {transform_indices = @transform_10, window_bounds = array<i64: 1, 1, 32>}, {transform_indices = @transform_11, window_bounds = array<i64: 1, 32, 32>}, {transform_indices = @transform_12, window_bounds = array<i64: 1, 1, 32>}, {transform_indices = @transform_13, window_bounds = array<i64: 1, 32, 64>}, {transform_indices = @transform_14, window_bounds = array<i64: 1, 1, 64>}, {transform_indices = @transform_15, window_bounds = array<i64: 1, 64, 32>}, {transform_indices = @transform_16, window_bounds = array<i64: 1, 1, 32>}, {transform_indices = @transform_17, window_bounds = array<i64: 1, 3, 32>}, {transform_indices = @transform_18, window_bounds = array<i64: 1, 3, 32>}, {transform_indices = @transform_19, window_bounds = array<i64: 1, 1, 8, 32>}]} {
    %c0_i32 = arith.constant 0 : i32
    %0 = arith.cmpi eq, %arg1, %c0_i32 : i32
    %1 = arith.extui %0 : i1 to i32
    %c0_i32_0 = arith.constant 0 : i32
    %2 = arith.cmpi ne, %1, %c0_i32_0 : i32
    scf.if %2 {
      %c0_169 = arith.constant 0 : index
      %c0_170 = arith.constant 0 : index
      %c0_171 = arith.constant 0 : index
      %305 = vector.load %arg2[%c0_169, %c0_170, %c0_171] : memref<1x8x32xf32, #tpu.memory_space<vmem>>, vector<1x8x32xf32>
      %306 = vector.shape_cast %305 : vector<1x8x32xf32> to vector<8x32xf32>
      %c0_172 = arith.constant 0 : index
      %c0_173 = arith.constant 0 : index
      %307 = vector.load %arg22[%c0_172, %c0_173] : memref<8x32xf32, #tpu.memory_space<vmem>>, vector<8x32xf32>
      tpu.vector_store %arg22[%c0_172, %c0_173], %306 {strides = array<i32>} : memref<8x32xf32, #tpu.memory_space<vmem>>, vector<8x32xf32>,
    } else {
    }
    %c0 = arith.constant 0 : index
    %c0_1 = arith.constant 0 : index
    %3 = vector.load %arg22[%c0, %c0_1] : memref<8x32xf32, #tpu.memory_space<vmem>>, vector<8x32xf32>
    %c0_2 = arith.constant 0 : index
    %c0_3 = arith.constant 0 : index
    %c0_4 = arith.constant 0 : index
    %4 = vector.load %arg5[%c0_2, %c0_3, %c0_4] : memref<1x1x8xf32, #tpu.memory_space<vmem>>, vector<1x1x8xf32>
    %5 = vector.shape_cast %4 : vector<1x1x8xf32> to vector<1x8xf32>
    %c0_5 = arith.constant 0 : index
    %c0_6 = arith.constant 0 : index
    %c0_7 = arith.constant 0 : index
    %6 = vector.load %arg6[%c0_5, %c0_6, %c0_7] : memref<1x1x12xf32, #tpu.memory_space<vmem>>, vector<1x1x12xf32>
    %7 = vector.shape_cast %6 : vector<1x1x12xf32> to vector<1x12xf32>
    %c0_8 = arith.constant 0 : index
    %c0_9 = arith.constant 0 : index
    %c0_10 = arith.constant 0 : index
    %8 = vector.load %arg19[%c0_8, %c0_9, %c0_10] : memref<1x3x32xf32, #tpu.memory_space<vmem>>, vector<1x3x32xf32>
    %9 = vector.shape_cast %8 : vector<1x3x32xf32> to vector<3x32xf32>
    %c0_11 = arith.constant 0 : index
    %c0_12 = arith.constant 0 : index
    %c0_13 = arith.constant 0 : index
    %10 = vector.load %arg20[%c0_11, %c0_12, %c0_13] : memref<1x3x32xf32, #tpu.memory_space<vmem>>, vector<1x3x32xf32>
    %11 = vector.shape_cast %10 : vector<1x3x32xf32> to vector<3x32xf32>
    %12 = arith.truncf %3 : vector<8x32xf32> to vector<8x32xbf16>
    %c0_14 = arith.constant 0 : index
    %c0_15 = arith.constant 0 : index
    %c0_16 = arith.constant 0 : index
    %13 = vector.load %arg7[%c0_14, %c0_15, %c0_16] : memref<1x32x96xbf16, #tpu.memory_space<vmem>>, vector<1x32x96xbf16>
    %14 = vector.shape_cast %13 : vector<1x32x96xbf16> to vector<32x96xbf16>
    %cst = arith.constant dense<0.000000e+00> : vector<8x96xf32>
    %15 = tpu.matmul %12, %14, %cst {dimension_numbers = #tpu.dot_dimension_numbers<[1], [0], [0], [1], [0, 0, 1, 1], [], []>} : vector<8x32xbf16>, vector<32x96xbf16>, vector<8x96xf32> -> vector<8x96xf32>
    %c0_17 = arith.constant 0 : index
    %c0_18 = arith.constant 0 : index
    %c0_19 = arith.constant 0 : index
    %16 = vector.load %arg8[%c0_17, %c0_18, %c0_19] : memref<1x1x96xf32, #tpu.memory_space<vmem>>, vector<1x1x96xf32>
    %17 = vector.shape_cast %16 : vector<1x1x96xf32> to vector<1x96xf32>
    %18 = vector.broadcast %17 : vector<1x96xf32> to vector<8x96xf32>
    %19 = arith.addf %15, %18 : vector<8x96xf32>
    %20 = vector.extract_strided_slice %19 {offsets = [0, 0], sizes = [8, 8], strides = [1, 1]} : vector<8x96xf32> to vector<8x8xf32>
    %21 = arith.truncf %20 : vector<8x8xf32> to vector<8x8xbf16>
    %c0_20 = arith.constant 0 : index
    %c0_21 = arith.constant 0 : index
    %c0_22 = arith.constant 0 : index
    %22 = vector.load %arg23[%c0_20, %c0_21, %c0_22] : memref<4x8x8xbf16, #tpu.memory_space<vmem>>, vector<1x8x8xbf16>
    %23 = vector.shape_cast %22 : vector<1x8x8xbf16> to vector<8x8xbf16>
    %24 = vector.shape_cast %21 : vector<8x8xbf16> to vector<1x8x8xbf16>
    tpu.vector_store %arg23[%c0_20, %c0_21, %c0_22], %24 {strides = array<i32>} : memref<4x8x8xbf16, #tpu.memory_space<vmem>>, vector<1x8x8xbf16>,
    %25 = vector.extract_strided_slice %19 {offsets = [0, 32], sizes = [8, 8], strides = [1, 1]} : vector<8x96xf32> to vector<8x8xf32>
    %26 = arith.truncf %25 : vector<8x8xf32> to vector<8x8xbf16>
    %c0_23 = arith.constant 0 : index
    %c0_24 = arith.constant 0 : index
    %c0_25 = arith.constant 0 : index
    %27 = vector.load %arg24[%c0_23, %c0_24, %c0_25] : memref<4x8x8xbf16, #tpu.memory_space<vmem>>, vector<1x8x8xbf16>
    %28 = vector.shape_cast %27 : vector<1x8x8xbf16> to vector<8x8xbf16>
    %29 = vector.shape_cast %26 : vector<8x8xbf16> to vector<1x8x8xbf16>
    tpu.vector_store %arg24[%c0_23, %c0_24, %c0_25], %29 {strides = array<i32>} : memref<4x8x8xbf16, #tpu.memory_space<vmem>>, vector<1x8x8xbf16>,
    %30 = vector.extract_strided_slice %19 {offsets = [0, 64], sizes = [8, 8], strides = [1, 1]} : vector<8x96xf32> to vector<8x8xf32>
    %31 = arith.truncf %30 : vector<8x8xf32> to vector<8x8xbf16>
    %c0_26 = arith.constant 0 : index
    %c0_27 = arith.constant 0 : index
    %c0_28 = arith.constant 0 : index
    %32 = vector.load %arg25[%c0_26, %c0_27, %c0_28] : memref<4x8x8xbf16, #tpu.memory_space<vmem>>, vector<1x8x8xbf16>
    %33 = vector.shape_cast %32 : vector<1x8x8xbf16> to vector<8x8xbf16>
    %34 = vector.shape_cast %31 : vector<8x8xbf16> to vector<1x8x8xbf16>
    tpu.vector_store %arg25[%c0_26, %c0_27, %c0_28], %34 {strides = array<i32>} : memref<4x8x8xbf16, #tpu.memory_space<vmem>>, vector<1x8x8xbf16>,
    %35 = vector.extract_strided_slice %19 {offsets = [0, 8], sizes = [8, 8], strides = [1, 1]} : vector<8x96xf32> to vector<8x8xf32>
    %36 = arith.truncf %35 : vector<8x8xf32> to vector<8x8xbf16>
    %c1 = arith.constant 1 : index
    %c0_29 = arith.constant 0 : index
    %c0_30 = arith.constant 0 : index
    %37 = vector.load %arg23[%c1, %c0_29, %c0_30] : memref<4x8x8xbf16, #tpu.memory_space<vmem>>, vector<1x8x8xbf16>
    %38 = vector.shape_cast %37 : vector<1x8x8xbf16> to vector<8x8xbf16>
    %39 = vector.shape_cast %36 : vector<8x8xbf16> to vector<1x8x8xbf16>
    tpu.vector_store %arg23[%c1, %c0_29, %c0_30], %39 {strides = array<i32>} : memref<4x8x8xbf16, #tpu.memory_space<vmem>>, vector<1x8x8xbf16>,
    %40 = vector.extract_strided_slice %19 {offsets = [0, 40], sizes = [8, 8], strides = [1, 1]} : vector<8x96xf32> to vector<8x8xf32>
    %41 = arith.truncf %40 : vector<8x8xf32> to vector<8x8xbf16>
    %c1_31 = arith.constant 1 : index
    %c0_32 = arith.constant 0 : index
    %c0_33 = arith.constant 0 : index
    %42 = vector.load %arg24[%c1_31, %c0_32, %c0_33] : memref<4x8x8xbf16, #tpu.memory_space<vmem>>, vector<1x8x8xbf16>
    %43 = vector.shape_cast %42 : vector<1x8x8xbf16> to vector<8x8xbf16>
    %44 = vector.shape_cast %41 : vector<8x8xbf16> to vector<1x8x8xbf16>
    tpu.vector_store %arg24[%c1_31, %c0_32, %c0_33], %44 {strides = array<i32>} : memref<4x8x8xbf16, #tpu.memory_space<vmem>>, vector<1x8x8xbf16>,
    %45 = vector.extract_strided_slice %19 {offsets = [0, 72], sizes = [8, 8], strides = [1, 1]} : vector<8x96xf32> to vector<8x8xf32>
    %46 = arith.truncf %45 : vector<8x8xf32> to vector<8x8xbf16>
    %c1_34 = arith.constant 1 : index
    %c0_35 = arith.constant 0 : index
    %c0_36 = arith.constant 0 : index
    %47 = vector.load %arg25[%c1_34, %c0_35, %c0_36] : memref<4x8x8xbf16, #tpu.memory_space<vmem>>, vector<1x8x8xbf16>
    %48 = vector.shape_cast %47 : vector<1x8x8xbf16> to vector<8x8xbf16>
    %49 = vector.shape_cast %46 : vector<8x8xbf16> to vector<1x8x8xbf16>
    tpu.vector_store %arg25[%c1_34, %c0_35, %c0_36], %49 {strides = array<i32>} : memref<4x8x8xbf16, #tpu.memory_space<vmem>>, vector<1x8x8xbf16>,
    %50 = vector.extract_strided_slice %19 {offsets = [0, 16], sizes = [8, 8], strides = [1, 1]} : vector<8x96xf32> to vector<8x8xf32>
    %51 = arith.truncf %50 : vector<8x8xf32> to vector<8x8xbf16>
    %c2 = arith.constant 2 : index
    %c0_37 = arith.constant 0 : index
    %c0_38 = arith.constant 0 : index
    %52 = vector.load %arg23[%c2, %c0_37, %c0_38] : memref<4x8x8xbf16, #tpu.memory_space<vmem>>, vector<1x8x8xbf16>
    %53 = vector.shape_cast %52 : vector<1x8x8xbf16> to vector<8x8xbf16>
    %54 = vector.shape_cast %51 : vector<8x8xbf16> to vector<1x8x8xbf16>
    tpu.vector_store %arg23[%c2, %c0_37, %c0_38], %54 {strides = array<i32>} : memref<4x8x8xbf16, #tpu.memory_space<vmem>>, vector<1x8x8xbf16>,
    %55 = vector.extract_strided_slice %19 {offsets = [0, 48], sizes = [8, 8], strides = [1, 1]} : vector<8x96xf32> to vector<8x8xf32>
    %56 = arith.truncf %55 : vector<8x8xf32> to vector<8x8xbf16>
    %c2_39 = arith.constant 2 : index
    %c0_40 = arith.constant 0 : index
    %c0_41 = arith.constant 0 : index
    %57 = vector.load %arg24[%c2_39, %c0_40, %c0_41] : memref<4x8x8xbf16, #tpu.memory_space<vmem>>, vector<1x8x8xbf16>
    %58 = vector.shape_cast %57 : vector<1x8x8xbf16> to vector<8x8xbf16>
    %59 = vector.shape_cast %56 : vector<8x8xbf16> to vector<1x8x8xbf16>
    tpu.vector_store %arg24[%c2_39, %c0_40, %c0_41], %59 {strides = array<i32>} : memref<4x8x8xbf16, #tpu.memory_space<vmem>>, vector<1x8x8xbf16>,
    %60 = vector.extract_strided_slice %19 {offsets = [0, 80], sizes = [8, 8], strides = [1, 1]} : vector<8x96xf32> to vector<8x8xf32>
    %61 = arith.truncf %60 : vector<8x8xf32> to vector<8x8xbf16>
    %c2_42 = arith.constant 2 : index
    %c0_43 = arith.constant 0 : index
    %c0_44 = arith.constant 0 : index
    %62 = vector.load %arg25[%c2_42, %c0_43, %c0_44] : memref<4x8x8xbf16, #tpu.memory_space<vmem>>, vector<1x8x8xbf16>
    %63 = vector.shape_cast %62 : vector<1x8x8xbf16> to vector<8x8xbf16>
    %64 = vector.shape_cast %61 : vector<8x8xbf16> to vector<1x8x8xbf16>
    tpu.vector_store %arg25[%c2_42, %c0_43, %c0_44], %64 {strides = array<i32>} : memref<4x8x8xbf16, #tpu.memory_space<vmem>>, vector<1x8x8xbf16>,
    %65 = vector.extract_strided_slice %19 {offsets = [0, 24], sizes = [8, 8], strides = [1, 1]} : vector<8x96xf32> to vector<8x8xf32>
    %66 = arith.truncf %65 : vector<8x8xf32> to vector<8x8xbf16>
    %c3 = arith.constant 3 : index
    %c0_45 = arith.constant 0 : index
    %c0_46 = arith.constant 0 : index
    %67 = vector.load %arg23[%c3, %c0_45, %c0_46] : memref<4x8x8xbf16, #tpu.memory_space<vmem>>, vector<1x8x8xbf16>
    %68 = vector.shape_cast %67 : vector<1x8x8xbf16> to vector<8x8xbf16>
    %69 = vector.shape_cast %66 : vector<8x8xbf16> to vector<1x8x8xbf16>
    tpu.vector_store %arg23[%c3, %c0_45, %c0_46], %69 {strides = array<i32>} : memref<4x8x8xbf16, #tpu.memory_space<vmem>>, vector<1x8x8xbf16>,
    %70 = vector.extract_strided_slice %19 {offsets = [0, 56], sizes = [8, 8], strides = [1, 1]} : vector<8x96xf32> to vector<8x8xf32>
    %71 = arith.truncf %70 : vector<8x8xf32> to vector<8x8xbf16>
    %c3_47 = arith.constant 3 : index
    %c0_48 = arith.constant 0 : index
    %c0_49 = arith.constant 0 : index
    %72 = vector.load %arg24[%c3_47, %c0_48, %c0_49] : memref<4x8x8xbf16, #tpu.memory_space<vmem>>, vector<1x8x8xbf16>
    %73 = vector.shape_cast %72 : vector<1x8x8xbf16> to vector<8x8xbf16>
    %74 = vector.shape_cast %71 : vector<8x8xbf16> to vector<1x8x8xbf16>
    tpu.vector_store %arg24[%c3_47, %c0_48, %c0_49], %74 {strides = array<i32>} : memref<4x8x8xbf16, #tpu.memory_space<vmem>>, vector<1x8x8xbf16>,
    %75 = vector.extract_strided_slice %19 {offsets = [0, 88], sizes = [8, 8], strides = [1, 1]} : vector<8x96xf32> to vector<8x8xf32>
    %76 = arith.truncf %75 : vector<8x8xf32> to vector<8x8xbf16>
    %c3_50 = arith.constant 3 : index
    %c0_51 = arith.constant 0 : index
    %c0_52 = arith.constant 0 : index
    %77 = vector.load %arg25[%c3_50, %c0_51, %c0_52] : memref<4x8x8xbf16, #tpu.memory_space<vmem>>, vector<1x8x8xbf16>
    %78 = vector.shape_cast %77 : vector<1x8x8xbf16> to vector<8x8xbf16>
    %79 = vector.shape_cast %76 : vector<8x8xbf16> to vector<1x8x8xbf16>
    tpu.vector_store %arg25[%c3_50, %c0_51, %c0_52], %79 {strides = array<i32>} : memref<4x8x8xbf16, #tpu.memory_space<vmem>>, vector<1x8x8xbf16>,
    %c0_53 = arith.constant 0 : index
    %c0_54 = arith.constant 0 : index
    %c0_55 = arith.constant 0 : index
    %80 = vector.load %arg24[%c0_53, %c0_54, %c0_55] : memref<4x8x8xbf16, #tpu.memory_space<vmem>>, vector<4x8x8xbf16>
    %c0_56 = arith.constant 0 : index
    %c0_57 = arith.constant 0 : index
    %c0_58 = arith.constant 0 : index
    %81 = vector.load %arg25[%c0_56, %c0_57, %c0_58] : memref<4x8x8xbf16, #tpu.memory_space<vmem>>, vector<4x8x8xbf16>
    %c0_59 = arith.constant 0 : index
    %c0_60 = arith.constant 0 : index
    %c0_61 = arith.constant 0 : index
    %82 = vector.load %arg9[%c0_59, %c0_60, %c0_61] : memref<1x32x32xbf16, #tpu.memory_space<vmem>>, vector<1x32x32xbf16>
    %83 = vector.shape_cast %82 : vector<1x32x32xbf16> to vector<32x32xbf16>
    %c0_62 = arith.constant 0 : index
    %c0_63 = arith.constant 0 : index
    %c0_64 = arith.constant 0 : index
    %84 = vector.load %arg10[%c0_62, %c0_63, %c0_64] : memref<1x1x32xf32, #tpu.memory_space<vmem>>, vector<1x1x32xf32>
    %85 = vector.shape_cast %84 : vector<1x1x32xf32> to vector<1x32xf32>
    %c0_65 = arith.constant 0 : index
    %c0_66 = arith.constant 0 : index
    %c0_67 = arith.constant 0 : index
    %86 = vector.load %arg23[%c0_65, %c0_66, %c0_67] : memref<4x8x8xbf16, #tpu.memory_space<vmem>>, vector<4x8x8xbf16>
    "tpu.trace_start"() <{level = 10 : i32, message = "hld,hkd->hlk"}> : () -> ()
    %cst_68 = arith.constant dense<0.000000e+00> : vector<4x8x8xf32>
    %87 = tpu.matmul %86, %80, %cst_68 {dimension_numbers = #tpu.dot_dimension_numbers<[2], [2], [1], [1], [0, 0, 0, 1, 1, 1], [0], [0]>} : vector<4x8x8xbf16>, vector<4x8x8xbf16>, vector<4x8x8xf32> -> vector<4x8x8xf32>
    "tpu.trace_stop"() : () -> ()
    %88 = vector.shape_cast %5 : vector<1x8xf32> to vector<1x1x8xf32>
    %89 = vector.broadcast %88 : vector<1x1x8xf32> to vector<4x8x8xf32>
    %90 = arith.addf %87, %89 : vector<4x8x8xf32>
    %cst_69 = arith.constant dense<0xFF800000> : vector<4x8xf32>
    %91 = vector.multi_reduction <maximumf>, %90, %cst_69 [2] : vector<4x8x8xf32> to vector<4x8xf32>
    %92 = vector.shape_cast %91 : vector<4x8xf32> to vector<4x8x1xf32>
    %93 = vector.broadcast %92 : vector<4x8x1xf32> to vector<4x8x8xf32>
    %94 = arith.subf %90, %93 : vector<4x8x8xf32>
    %95 = math.exp %94 : vector<4x8x8xf32>
    %cst_70 = arith.constant dense<0.000000e+00> : vector<4x8xf32>
    %96 = vector.multi_reduction <add>, %95, %cst_70 [2] : vector<4x8x8xf32> to vector<4x8xf32>
    %97 = vector.shape_cast %96 : vector<4x8xf32> to vector<4x8x1xf32>
    %98 = tpu.reciprocal %97 {approx = true} : vector<4x8x1xf32> -> vector<4x8x1xf32>
    %99 = vector.broadcast %98 : vector<4x8x1xf32> to vector<4x8x8xf32>
    %100 = arith.mulf %95, %99 : vector<4x8x8xf32>
    %101 = arith.truncf %100 : vector<4x8x8xf32> to vector<4x8x8xbf16>
    "tpu.trace_start"() <{level = 10 : i32, message = "hlk,hkd->hld"}> : () -> ()
    %cst_71 = arith.constant dense<0.000000e+00> : vector<4x8x8xf32>
    %102 = tpu.matmul %101, %81, %cst_71 {dimension_numbers = #tpu.dot_dimension_numbers<[2], [1], [1], [2], [0, 0, 0, 1, 1, 2], [0], [0]>} : vector<4x8x8xbf16>, vector<4x8x8xbf16>, vector<4x8x8xf32> -> vector<4x8x8xf32>
    "tpu.trace_stop"() : () -> ()
    %103 = vector.extract_strided_slice %102 {offsets = [0, 0, 0], sizes = [1, 8, 8], strides = [1, 1, 1]} : vector<4x8x8xf32> to vector<1x8x8xf32>
    %104 = vector.shape_cast %103 : vector<1x8x8xf32> to vector<8x8xf32>
    %105 = arith.truncf %104 : vector<8x8xf32> to vector<8x8xbf16>
    %c0_72 = arith.constant 0 : index
    %c0_73 = arith.constant 0 : index
    %106 = vector.load %arg26[%c0_72, %c0_73] : memref<8x32xbf16, #tpu.memory_space<vmem>>, vector<8x8xbf16>
    tpu.vector_store %arg26[%c0_72, %c0_73], %105 {strides = array<i32>} : memref<8x32xbf16, #tpu.memory_space<vmem>>, vector<8x8xbf16>,
    %107 = vector.extract_strided_slice %102 {offsets = [1, 0, 0], sizes = [1, 8, 8], strides = [1, 1, 1]} : vector<4x8x8xf32> to vector<1x8x8xf32>
    %108 = vector.shape_cast %107 : vector<1x8x8xf32> to vector<8x8xf32>
    %109 = arith.truncf %108 : vector<8x8xf32> to vector<8x8xbf16>
    %c0_74 = arith.constant 0 : index
    %c8 = arith.constant 8 : index
    %110 = vector.load %arg26[%c0_74, %c8] : memref<8x32xbf16, #tpu.memory_space<vmem>>, vector<8x8xbf16>
    tpu.vector_store %arg26[%c0_74, %c8], %109 {strides = array<i32>} : memref<8x32xbf16, #tpu.memory_space<vmem>>, vector<8x8xbf16>,
    %111 = vector.extract_strided_slice %102 {offsets = [2, 0, 0], sizes = [1, 8, 8], strides = [1, 1, 1]} : vector<4x8x8xf32> to vector<1x8x8xf32>
    %112 = vector.shape_cast %111 : vector<1x8x8xf32> to vector<8x8xf32>
    %113 = arith.truncf %112 : vector<8x8xf32> to vector<8x8xbf16>
    %c0_75 = arith.constant 0 : index
    %c16 = arith.constant 16 : index
    %114 = vector.load %arg26[%c0_75, %c16] : memref<8x32xbf16, #tpu.memory_space<vmem>>, vector<8x8xbf16>
    tpu.vector_store %arg26[%c0_75, %c16], %113 {strides = array<i32>} : memref<8x32xbf16, #tpu.memory_space<vmem>>, vector<8x8xbf16>,
    %115 = vector.extract_strided_slice %102 {offsets = [3, 0, 0], sizes = [1, 8, 8], strides = [1, 1, 1]} : vector<4x8x8xf32> to vector<1x8x8xf32>
    %116 = vector.shape_cast %115 : vector<1x8x8xf32> to vector<8x8xf32>
    %117 = arith.truncf %116 : vector<8x8xf32> to vector<8x8xbf16>
    %c0_76 = arith.constant 0 : index
    %c24 = arith.constant 24 : index
    %118 = vector.load %arg26[%c0_76, %c24] : memref<8x32xbf16, #tpu.memory_space<vmem>>, vector<8x8xbf16>
    tpu.vector_store %arg26[%c0_76, %c24], %117 {strides = array<i32>} : memref<8x32xbf16, #tpu.memory_space<vmem>>, vector<8x8xbf16>,
    %c0_77 = arith.constant 0 : index
    %c0_78 = arith.constant 0 : index
    %119 = vector.load %arg26[%c0_77, %c0_78] : memref<8x32xbf16, #tpu.memory_space<vmem>>, vector<8x32xbf16>
    %cst_79 = arith.constant dense<0.000000e+00> : vector<8x32xf32>
    %120 = tpu.matmul %119, %83, %cst_79 {dimension_numbers = #tpu.dot_dimension_numbers<[1], [0], [0], [1], [0, 0, 1, 1], [], []>} : vector<8x32xbf16>, vector<32x32xbf16>, vector<8x32xf32> -> vector<8x32xf32>
    %121 = vector.broadcast %85 : vector<1x32xf32> to vector<8x32xf32>
    %122 = arith.addf %120, %121 : vector<8x32xf32>
    %123 = arith.addf %3, %122 : vector<8x32xf32>
    %cst_80 = arith.constant dense<0.000000e+00> : vector<8xf32>
    %124 = vector.multi_reduction <add>, %123, %cst_80 [1] : vector<8x32xf32> to vector<8xf32>
    %125 = vector.shape_cast %124 : vector<8xf32> to vector<8x1xf32>
    %cst_81 = arith.constant 3.200000e+01 : f32
    %126 = vector.broadcast %cst_81 : f32 to vector<8x1xf32>
    %127 = arith.divf %125, %126 : vector<8x1xf32>
    %128 = vector.broadcast %127 : vector<8x1xf32> to vector<8x32xf32>
    %129 = arith.subf %123, %128 : vector<8x32xf32>
    %130 = arith.mulf %129, %129 : vector<8x32xf32>
    %cst_82 = arith.constant dense<0.000000e+00> : vector<8xf32>
    %131 = vector.multi_reduction <add>, %130, %cst_82 [1] : vector<8x32xf32> to vector<8xf32>
    %132 = vector.shape_cast %131 : vector<8xf32> to vector<8x1xf32>
    %cst_83 = arith.constant 3.200000e+01 : f32
    %133 = vector.broadcast %cst_83 : f32 to vector<8x1xf32>
    %134 = arith.divf %132, %133 : vector<8x1xf32>
    %135 = vector.broadcast %127 : vector<8x1xf32> to vector<8x32xf32>
    %136 = arith.subf %123, %135 : vector<8x32xf32>
    %cst_84 = arith.constant 9.99999974E-6 : f32
    %137 = vector.broadcast %cst_84 : f32 to vector<8x1xf32>
    %138 = arith.addf %134, %137 : vector<8x1xf32>
    %139 = math.rsqrt %138 : vector<8x1xf32>
    %140 = vector.broadcast %139 : vector<8x1xf32> to vector<8x32xf32>
    %141 = arith.mulf %136, %140 : vector<8x32xf32>
    %142 = vector.extract_strided_slice %9 {offsets = [0, 0], sizes = [1, 32], strides = [1, 1]} : vector<3x32xf32> to vector<1x32xf32>
    %143 = vector.shape_cast %142 : vector<1x32xf32> to vector<32xf32>
    %144 = vector.shape_cast %143 : vector<32xf32> to vector<1x32xf32>
    %145 = vector.broadcast %144 : vector<1x32xf32> to vector<8x32xf32>
    %146 = arith.mulf %141, %145 : vector<8x32xf32>
    %147 = vector.extract_strided_slice %11 {offsets = [0, 0], sizes = [1, 32], strides = [1, 1]} : vector<3x32xf32> to vector<1x32xf32>
    %148 = vector.shape_cast %147 : vector<1x32xf32> to vector<32xf32>
    %149 = vector.shape_cast %148 : vector<32xf32> to vector<1x32xf32>
    %150 = vector.broadcast %149 : vector<1x32xf32> to vector<8x32xf32>
    %151 = arith.addf %146, %150 : vector<8x32xf32>
    %152 = arith.truncf %151 : vector<8x32xf32> to vector<8x32xbf16>
    %c0_85 = arith.constant 0 : index
    %c0_86 = arith.constant 0 : index
    %c0_87 = arith.constant 0 : index
    %153 = vector.load %arg11[%c0_85, %c0_86, %c0_87] : memref<1x32x32xbf16, #tpu.memory_space<vmem>>, vector<1x32x32xbf16>
    %154 = vector.shape_cast %153 : vector<1x32x32xbf16> to vector<32x32xbf16>
    %cst_88 = arith.constant dense<0.000000e+00> : vector<8x32xf32>
    %155 = tpu.matmul %152, %154, %cst_88 {dimension_numbers = #tpu.dot_dimension_numbers<[1], [0], [0], [1], [0, 0, 1, 1], [], []>} : vector<8x32xbf16>, vector<32x32xbf16>, vector<8x32xf32> -> vector<8x32xf32>
    %c0_89 = arith.constant 0 : index
    %c0_90 = arith.constant 0 : index
    %c0_91 = arith.constant 0 : index
    %156 = vector.load %arg12[%c0_89, %c0_90, %c0_91] : memref<1x1x32xf32, #tpu.memory_space<vmem>>, vector<1x1x32xf32>
    %157 = vector.shape_cast %156 : vector<1x1x32xf32> to vector<1x32xf32>
    %158 = vector.broadcast %157 : vector<1x32xf32> to vector<8x32xf32>
    %159 = arith.addf %155, %158 : vector<8x32xf32>
    %160 = vector.extract_strided_slice %159 {offsets = [0, 0], sizes = [8, 8], strides = [1, 1]} : vector<8x32xf32> to vector<8x8xf32>
    %161 = arith.truncf %160 : vector<8x8xf32> to vector<8x8xbf16>
    %c0_92 = arith.constant 0 : index
    %c0_93 = arith.constant 0 : index
    %c0_94 = arith.constant 0 : index
    %162 = vector.load %arg23[%c0_92, %c0_93, %c0_94] : memref<4x8x8xbf16, #tpu.memory_space<vmem>>, vector<1x8x8xbf16>
    %163 = vector.shape_cast %162 : vector<1x8x8xbf16> to vector<8x8xbf16>
    %164 = vector.shape_cast %161 : vector<8x8xbf16> to vector<1x8x8xbf16>
    tpu.vector_store %arg23[%c0_92, %c0_93, %c0_94], %164 {strides = array<i32>} : memref<4x8x8xbf16, #tpu.memory_space<vmem>>, vector<1x8x8xbf16>,
    %165 = vector.extract_strided_slice %159 {offsets = [0, 8], sizes = [8, 8], strides = [1, 1]} : vector<8x32xf32> to vector<8x8xf32>
    %166 = arith.truncf %165 : vector<8x8xf32> to vector<8x8xbf16>
    %c1_95 = arith.constant 1 : index
    %c0_96 = arith.constant 0 : index
    %c0_97 = arith.constant 0 : index
    %167 = vector.load %arg23[%c1_95, %c0_96, %c0_97] : memref<4x8x8xbf16, #tpu.memory_space<vmem>>, vector<1x8x8xbf16>
    %168 = vector.shape_cast %167 : vector<1x8x8xbf16> to vector<8x8xbf16>
    %169 = vector.shape_cast %166 : vector<8x8xbf16> to vector<1x8x8xbf16>
    tpu.vector_store %arg23[%c1_95, %c0_96, %c0_97], %169 {strides = array<i32>} : memref<4x8x8xbf16, #tpu.memory_space<vmem>>, vector<1x8x8xbf16>,
    %170 = vector.extract_strided_slice %159 {offsets = [0, 16], sizes = [8, 8], strides = [1, 1]} : vector<8x32xf32> to vector<8x8xf32>
    %171 = arith.truncf %170 : vector<8x8xf32> to vector<8x8xbf16>
    %c2_98 = arith.constant 2 : index
    %c0_99 = arith.constant 0 : index
    %c0_100 = arith.constant 0 : index
    %172 = vector.load %arg23[%c2_98, %c0_99, %c0_100] : memref<4x8x8xbf16, #tpu.memory_space<vmem>>, vector<1x8x8xbf16>
    %173 = vector.shape_cast %172 : vector<1x8x8xbf16> to vector<8x8xbf16>
    %174 = vector.shape_cast %171 : vector<8x8xbf16> to vector<1x8x8xbf16>
    tpu.vector_store %arg23[%c2_98, %c0_99, %c0_100], %174 {strides = array<i32>} : memref<4x8x8xbf16, #tpu.memory_space<vmem>>, vector<1x8x8xbf16>,
    %175 = vector.extract_strided_slice %159 {offsets = [0, 24], sizes = [8, 8], strides = [1, 1]} : vector<8x32xf32> to vector<8x8xf32>
    %176 = arith.truncf %175 : vector<8x8xf32> to vector<8x8xbf16>
    %c3_101 = arith.constant 3 : index
    %c0_102 = arith.constant 0 : index
    %c0_103 = arith.constant 0 : index
    %177 = vector.load %arg23[%c3_101, %c0_102, %c0_103] : memref<4x8x8xbf16, #tpu.memory_space<vmem>>, vector<1x8x8xbf16>
    %178 = vector.shape_cast %177 : vector<1x8x8xbf16> to vector<8x8xbf16>
    %179 = vector.shape_cast %176 : vector<8x8xbf16> to vector<1x8x8xbf16>
    tpu.vector_store %arg23[%c3_101, %c0_102, %c0_103], %179 {strides = array<i32>} : memref<4x8x8xbf16, #tpu.memory_space<vmem>>, vector<1x8x8xbf16>,
    %c0_104 = arith.constant 0 : index
    %c0_105 = arith.constant 0 : index
    %c0_106 = arith.constant 0 : index
    %c0_107 = arith.constant 0 : index
    %c0_108 = arith.constant 0 : index
    %180 = vector.load %arg3[%c0_104, %c0_105, %c0_106, %c0_107, %c0_108] : memref<1x1x4x12x8xbf16, #tpu.memory_space<vmem>>, vector<1x1x4x12x8xbf16>
    %181 = vector.shape_cast %180 : vector<1x1x4x12x8xbf16> to vector<4x12x8xbf16>
    %c0_109 = arith.constant 0 : index
    %c0_110 = arith.constant 0 : index
    %c0_111 = arith.constant 0 : index
    %c0_112 = arith.constant 0 : index
    %c0_113 = arith.constant 0 : index
    %182 = vector.load %arg4[%c0_109, %c0_110, %c0_111, %c0_112, %c0_113] : memref<1x1x4x12x8xbf16, #tpu.memory_space<vmem>>, vector<1x1x4x12x8xbf16>
    %183 = vector.shape_cast %182 : vector<1x1x4x12x8xbf16> to vector<4x12x8xbf16>
    %c0_114 = arith.constant 0 : index
    %c0_115 = arith.constant 0 : index
    %c0_116 = arith.constant 0 : index
    %184 = vector.load %arg13[%c0_114, %c0_115, %c0_116] : memref<1x32x32xbf16, #tpu.memory_space<vmem>>, vector<1x32x32xbf16>
    %185 = vector.shape_cast %184 : vector<1x32x32xbf16> to vector<32x32xbf16>
    %c0_117 = arith.constant 0 : index
    %c0_118 = arith.constant 0 : index
    %c0_119 = arith.constant 0 : index
    %186 = vector.load %arg14[%c0_117, %c0_118, %c0_119] : memref<1x1x32xf32, #tpu.memory_space<vmem>>, vector<1x1x32xf32>
    %187 = vector.shape_cast %186 : vector<1x1x32xf32> to vector<1x32xf32>
    %c0_120 = arith.constant 0 : index
    %c0_121 = arith.constant 0 : index
    %c0_122 = arith.constant 0 : index
    %188 = vector.load %arg23[%c0_120, %c0_121, %c0_122] : memref<4x8x8xbf16, #tpu.memory_space<vmem>>, vector<4x8x8xbf16>
    "tpu.trace_start"() <{level = 10 : i32, message = "hld,hkd->hlk"}> : () -> ()
    %cst_123 = arith.constant dense<0.000000e+00> : vector<4x8x12xf32>
    %189 = tpu.matmul %188, %181, %cst_123 {dimension_numbers = #tpu.dot_dimension_numbers<[2], [2], [1], [1], [0, 0, 0, 1, 1, 1], [0], [0]>} : vector<4x8x8xbf16>, vector<4x12x8xbf16>, vector<4x8x12xf32> -> vector<4x8x12xf32>
    "tpu.trace_stop"() : () -> ()
    %190 = vector.shape_cast %7 : vector<1x12xf32> to vector<1x1x12xf32>
    %191 = vector.broadcast %190 : vector<1x1x12xf32> to vector<4x8x12xf32>
    %192 = arith.addf %189, %191 : vector<4x8x12xf32>
    %cst_124 = arith.constant dense<0xFF800000> : vector<4x8xf32>
    %193 = vector.multi_reduction <maximumf>, %192, %cst_124 [2] : vector<4x8x12xf32> to vector<4x8xf32>
    %194 = vector.shape_cast %193 : vector<4x8xf32> to vector<4x8x1xf32>
    %195 = vector.broadcast %194 : vector<4x8x1xf32> to vector<4x8x12xf32>
    %196 = arith.subf %192, %195 : vector<4x8x12xf32>
    %197 = math.exp %196 : vector<4x8x12xf32>
    %cst_125 = arith.constant dense<0.000000e+00> : vector<4x8xf32>
    %198 = vector.multi_reduction <add>, %197, %cst_125 [2] : vector<4x8x12xf32> to vector<4x8xf32>
    %199 = vector.shape_cast %198 : vector<4x8xf32> to vector<4x8x1xf32>
    %200 = tpu.reciprocal %199 {approx = true} : vector<4x8x1xf32> -> vector<4x8x1xf32>
    %201 = vector.broadcast %200 : vector<4x8x1xf32> to vector<4x8x12xf32>
    %202 = arith.mulf %197, %201 : vector<4x8x12xf32>
    %203 = arith.truncf %202 : vector<4x8x12xf32> to vector<4x8x12xbf16>
    "tpu.trace_start"() <{level = 10 : i32, message = "hlk,hkd->hld"}> : () -> ()
    %cst_126 = arith.constant dense<0.000000e+00> : vector<4x8x8xf32>
    %204 = tpu.matmul %203, %183, %cst_126 {dimension_numbers = #tpu.dot_dimension_numbers<[2], [1], [1], [2], [0, 0, 0, 1, 1, 2], [0], [0]>} : vector<4x8x12xbf16>, vector<4x12x8xbf16>, vector<4x8x8xf32> -> vector<4x8x8xf32>
    "tpu.trace_stop"() : () -> ()
    %205 = vector.extract_strided_slice %204 {offsets = [0, 0, 0], sizes = [1, 8, 8], strides = [1, 1, 1]} : vector<4x8x8xf32> to vector<1x8x8xf32>
    %206 = vector.shape_cast %205 : vector<1x8x8xf32> to vector<8x8xf32>
    %207 = arith.truncf %206 : vector<8x8xf32> to vector<8x8xbf16>
    %c0_127 = arith.constant 0 : index
    %c0_128 = arith.constant 0 : index
    %208 = vector.load %arg26[%c0_127, %c0_128] : memref<8x32xbf16, #tpu.memory_space<vmem>>, vector<8x8xbf16>
    tpu.vector_store %arg26[%c0_127, %c0_128], %207 {strides = array<i32>} : memref<8x32xbf16, #tpu.memory_space<vmem>>, vector<8x8xbf16>,
    %209 = vector.extract_strided_slice %204 {offsets = [1, 0, 0], sizes = [1, 8, 8], strides = [1, 1, 1]} : vector<4x8x8xf32> to vector<1x8x8xf32>
    %210 = vector.shape_cast %209 : vector<1x8x8xf32> to vector<8x8xf32>
    %211 = arith.truncf %210 : vector<8x8xf32> to vector<8x8xbf16>
    %c0_129 = arith.constant 0 : index
    %c8_130 = arith.constant 8 : index
    %212 = vector.load %arg26[%c0_129, %c8_130] : memref<8x32xbf16, #tpu.memory_space<vmem>>, vector<8x8xbf16>
    tpu.vector_store %arg26[%c0_129, %c8_130], %211 {strides = array<i32>} : memref<8x32xbf16, #tpu.memory_space<vmem>>, vector<8x8xbf16>,
    %213 = vector.extract_strided_slice %204 {offsets = [2, 0, 0], sizes = [1, 8, 8], strides = [1, 1, 1]} : vector<4x8x8xf32> to vector<1x8x8xf32>
    %214 = vector.shape_cast %213 : vector<1x8x8xf32> to vector<8x8xf32>
    %215 = arith.truncf %214 : vector<8x8xf32> to vector<8x8xbf16>
    %c0_131 = arith.constant 0 : index
    %c16_132 = arith.constant 16 : index
    %216 = vector.load %arg26[%c0_131, %c16_132] : memref<8x32xbf16, #tpu.memory_space<vmem>>, vector<8x8xbf16>
    tpu.vector_store %arg26[%c0_131, %c16_132], %215 {strides = array<i32>} : memref<8x32xbf16, #tpu.memory_space<vmem>>, vector<8x8xbf16>,
    %217 = vector.extract_strided_slice %204 {offsets = [3, 0, 0], sizes = [1, 8, 8], strides = [1, 1, 1]} : vector<4x8x8xf32> to vector<1x8x8xf32>
    %218 = vector.shape_cast %217 : vector<1x8x8xf32> to vector<8x8xf32>
    %219 = arith.truncf %218 : vector<8x8xf32> to vector<8x8xbf16>
    %c0_133 = arith.constant 0 : index
    %c24_134 = arith.constant 24 : index
    %220 = vector.load %arg26[%c0_133, %c24_134] : memref<8x32xbf16, #tpu.memory_space<vmem>>, vector<8x8xbf16>
    tpu.vector_store %arg26[%c0_133, %c24_134], %219 {strides = array<i32>} : memref<8x32xbf16, #tpu.memory_space<vmem>>, vector<8x8xbf16>,
    %c0_135 = arith.constant 0 : index
    %c0_136 = arith.constant 0 : index
    %221 = vector.load %arg26[%c0_135, %c0_136] : memref<8x32xbf16, #tpu.memory_space<vmem>>, vector<8x32xbf16>
    %cst_137 = arith.constant dense<0.000000e+00> : vector<8x32xf32>
    %222 = tpu.matmul %221, %185, %cst_137 {dimension_numbers = #tpu.dot_dimension_numbers<[1], [0], [0], [1], [0, 0, 1, 1], [], []>} : vector<8x32xbf16>, vector<32x32xbf16>, vector<8x32xf32> -> vector<8x32xf32>
    %223 = vector.broadcast %187 : vector<1x32xf32> to vector<8x32xf32>
    %224 = arith.addf %222, %223 : vector<8x32xf32>
    %225 = arith.addf %151, %224 : vector<8x32xf32>
    %cst_138 = arith.constant dense<0.000000e+00> : vector<8xf32>
    %226 = vector.multi_reduction <add>, %225, %cst_138 [1] : vector<8x32xf32> to vector<8xf32>
    %227 = vector.shape_cast %226 : vector<8xf32> to vector<8x1xf32>
    %cst_139 = arith.constant 3.200000e+01 : f32
    %228 = vector.broadcast %cst_139 : f32 to vector<8x1xf32>
    %229 = arith.divf %227, %228 : vector<8x1xf32>
    %230 = vector.broadcast %229 : vector<8x1xf32> to vector<8x32xf32>
    %231 = arith.subf %225, %230 : vector<8x32xf32>
    %232 = arith.mulf %231, %231 : vector<8x32xf32>
    %cst_140 = arith.constant dense<0.000000e+00> : vector<8xf32>
    %233 = vector.multi_reduction <add>, %232, %cst_140 [1] : vector<8x32xf32> to vector<8xf32>
    %234 = vector.shape_cast %233 : vector<8xf32> to vector<8x1xf32>
    %cst_141 = arith.constant 3.200000e+01 : f32
    %235 = vector.broadcast %cst_141 : f32 to vector<8x1xf32>
    %236 = arith.divf %234, %235 : vector<8x1xf32>
    %237 = vector.broadcast %229 : vector<8x1xf32> to vector<8x32xf32>
    %238 = arith.subf %225, %237 : vector<8x32xf32>
    %cst_142 = arith.constant 9.99999974E-6 : f32
    %239 = vector.broadcast %cst_142 : f32 to vector<8x1xf32>
    %240 = arith.addf %236, %239 : vector<8x1xf32>
    %241 = math.rsqrt %240 : vector<8x1xf32>
    %242 = vector.broadcast %241 : vector<8x1xf32> to vector<8x32xf32>
    %243 = arith.mulf %238, %242 : vector<8x32xf32>
    %244 = vector.extract_strided_slice %9 {offsets = [1, 0], sizes = [1, 32], strides = [1, 1]} : vector<3x32xf32> to vector<1x32xf32>
    %245 = vector.shape_cast %244 : vector<1x32xf32> to vector<32xf32>
    %246 = vector.shape_cast %245 : vector<32xf32> to vector<1x32xf32>
    %247 = vector.broadcast %246 : vector<1x32xf32> to vector<8x32xf32>
    %248 = arith.mulf %243, %247 : vector<8x32xf32>
    %249 = vector.extract_strided_slice %11 {offsets = [1, 0], sizes = [1, 32], strides = [1, 1]} : vector<3x32xf32> to vector<1x32xf32>
    %250 = vector.shape_cast %249 : vector<1x32xf32> to vector<32xf32>
    %251 = vector.shape_cast %250 : vector<32xf32> to vector<1x32xf32>
    %252 = vector.broadcast %251 : vector<1x32xf32> to vector<8x32xf32>
    %253 = arith.addf %248, %252 : vector<8x32xf32>
    %254 = arith.truncf %253 : vector<8x32xf32> to vector<8x32xbf16>
    %c0_143 = arith.constant 0 : index
    %c0_144 = arith.constant 0 : index
    %c0_145 = arith.constant 0 : index
    %255 = vector.load %arg15[%c0_143, %c0_144, %c0_145] : memref<1x32x64xbf16, #tpu.memory_space<vmem>>, vector<1x32x64xbf16>
    %256 = vector.shape_cast %255 : vector<1x32x64xbf16> to vector<32x64xbf16>
    %cst_146 = arith.constant dense<0.000000e+00> : vector<8x64xf32>
    %257 = tpu.matmul %254, %256, %cst_146 {dimension_numbers = #tpu.dot_dimension_numbers<[1], [0], [0], [1], [0, 0, 1, 1], [], []>} : vector<8x32xbf16>, vector<32x64xbf16>, vector<8x64xf32> -> vector<8x64xf32>
    %c0_147 = arith.constant 0 : index
    %c0_148 = arith.constant 0 : index
    %c0_149 = arith.constant 0 : index
    %258 = vector.load %arg16[%c0_147, %c0_148, %c0_149] : memref<1x1x64xf32, #tpu.memory_space<vmem>>, vector<1x1x64xf32>
    %259 = vector.shape_cast %258 : vector<1x1x64xf32> to vector<1x64xf32>
    %260 = vector.broadcast %259 : vector<1x64xf32> to vector<8x64xf32>
    %261 = arith.addf %257, %260 : vector<8x64xf32>
    %cst_150 = arith.constant 0.000000e+00 : f32
    %262 = vector.broadcast %cst_150 : f32 to vector<8x64xf32>
    %263 = arith.maximumf %261, %262 : vector<8x64xf32>
    %264 = arith.truncf %263 : vector<8x64xf32> to vector<8x64xbf16>
    %c0_151 = arith.constant 0 : index
    %c0_152 = arith.constant 0 : index
    %c0_153 = arith.constant 0 : index
    %265 = vector.load %arg17[%c0_151, %c0_152, %c0_153] : memref<1x64x32xbf16, #tpu.memory_space<vmem>>, vector<1x64x32xbf16>
    %266 = vector.shape_cast %265 : vector<1x64x32xbf16> to vector<64x32xbf16>
    %cst_154 = arith.constant dense<0.000000e+00> : vector<8x32xf32>
    %267 = tpu.matmul %264, %266, %cst_154 {dimension_numbers = #tpu.dot_dimension_numbers<[1], [0], [0], [1], [0, 0, 1, 1], [], []>} : vector<8x64xbf16>, vector<64x32xbf16>, vector<8x32xf32> -> vector<8x32xf32>
    %c0_155 = arith.constant 0 : index
    %c0_156 = arith.constant 0 : index
    %c0_157 = arith.constant 0 : index
    %268 = vector.load %arg18[%c0_155, %c0_156, %c0_157] : memref<1x1x32xf32, #tpu.memory_space<vmem>>, vector<1x1x32xf32>
    %269 = vector.shape_cast %268 : vector<1x1x32xf32> to vector<1x32xf32>
    %270 = vector.broadcast %269 : vector<1x32xf32> to vector<8x32xf32>
    %271 = arith.addf %267, %270 : vector<8x32xf32>
    %272 = arith.addf %253, %271 : vector<8x32xf32>
    %cst_158 = arith.constant dense<0.000000e+00> : vector<8xf32>
    %273 = vector.multi_reduction <add>, %272, %cst_158 [1] : vector<8x32xf32> to vector<8xf32>
    %274 = vector.shape_cast %273 : vector<8xf32> to vector<8x1xf32>
    %cst_159 = arith.constant 3.200000e+01 : f32
    %275 = vector.broadcast %cst_159 : f32 to vector<8x1xf32>
    %276 = arith.divf %274, %275 : vector<8x1xf32>
    %277 = vector.broadcast %276 : vector<8x1xf32> to vector<8x32xf32>
    %278 = arith.subf %272, %277 : vector<8x32xf32>
    %279 = arith.mulf %278, %278 : vector<8x32xf32>
    %cst_160 = arith.constant dense<0.000000e+00> : vector<8xf32>
    %280 = vector.multi_reduction <add>, %279, %cst_160 [1] : vector<8x32xf32> to vector<8xf32>
    %281 = vector.shape_cast %280 : vector<8xf32> to vector<8x1xf32>
    %cst_161 = arith.constant 3.200000e+01 : f32
    %282 = vector.broadcast %cst_161 : f32 to vector<8x1xf32>
    %283 = arith.divf %281, %282 : vector<8x1xf32>
    %284 = vector.broadcast %276 : vector<8x1xf32> to vector<8x32xf32>
    %285 = arith.subf %272, %284 : vector<8x32xf32>
    %cst_162 = arith.constant 9.99999974E-6 : f32
    %286 = vector.broadcast %cst_162 : f32 to vector<8x1xf32>
    %287 = arith.addf %283, %286 : vector<8x1xf32>
    %288 = math.rsqrt %287 : vector<8x1xf32>
    %289 = vector.broadcast %288 : vector<8x1xf32> to vector<8x32xf32>
    %290 = arith.mulf %285, %289 : vector<8x32xf32>
    %291 = vector.extract_strided_slice %9 {offsets = [2, 0], sizes = [1, 32], strides = [1, 1]} : vector<3x32xf32> to vector<1x32xf32>
    %292 = vector.shape_cast %291 : vector<1x32xf32> to vector<32xf32>
    %293 = vector.shape_cast %292 : vector<32xf32> to vector<1x32xf32>
    %294 = vector.broadcast %293 : vector<1x32xf32> to vector<8x32xf32>
    %295 = arith.mulf %290, %294 : vector<8x32xf32>
    %296 = vector.extract_strided_slice %11 {offsets = [2, 0], sizes = [1, 32], strides = [1, 1]} : vector<3x32xf32> to vector<1x32xf32>
    %297 = vector.shape_cast %296 : vector<1x32xf32> to vector<32xf32>
    %298 = vector.shape_cast %297 : vector<32xf32> to vector<1x32xf32>
    %299 = vector.broadcast %298 : vector<1x32xf32> to vector<8x32xf32>
    %300 = arith.addf %295, %299 : vector<8x32xf32>
    %c0_163 = arith.constant 0 : index
    %c0_164 = arith.constant 0 : index
    %301 = vector.load %arg22[%c0_163, %c0_164] : memref<8x32xf32, #tpu.memory_space<vmem>>, vector<8x32xf32>
    tpu.vector_store %arg22[%c0_163, %c0_164], %300 {strides = array<i32>} : memref<8x32xf32, #tpu.memory_space<vmem>>, vector<8x32xf32>,
    %c0_165 = arith.constant 0 : index
    %c0_166 = arith.constant 0 : index
    %c0_167 = arith.constant 0 : index
    %c0_168 = arith.constant 0 : index
    %302 = vector.load %arg21[%c0_165, %c0_166, %c0_167, %c0_168] : memref<1x1x8x32xf32, #tpu.memory_space<vmem>>, vector<1x1x8x32xf32>
    %303 = vector.shape_cast %302 : vector<1x1x8x32xf32> to vector<8x32xf32>
    %304 = vector.shape_cast %300 : vector<8x32xf32> to vector<1x1x8x32xf32>
    tpu.vector_store %arg21[%c0_165, %c0_166, %c0_167, %c0_168], %304 {strides = array<i32>} : memref<1x1x8x32xf32, #tpu.memory_space<vmem>>, vector<1x1x8x32xf32>,
    return
  }
  func.func @transform_0(%arg0: i32, %arg1: i32) -> (i32, i32, i32) {
    %c0_i32 = arith.constant 0 : i32
    %c0_i32_0 = arith.constant 0 : i32
    %c0_i32_1 = arith.constant 0 : i32
    return %arg0, %c0_i32, %c0_i32_0 : i32, i32, i32
  }
  func.func @transform_1(%arg0: i32, %arg1: i32) -> (i32, i32, i32, i32, i32) {
    %c0_i32 = arith.constant 0 : i32
    %c0_i32_0 = arith.constant 0 : i32
    %c0_i32_1 = arith.constant 0 : i32
    %c0_i32_2 = arith.constant 0 : i32
    return %arg1, %arg0, %c0_i32, %c0_i32_0, %c0_i32_1 : i32, i32, i32, i32, i32
  }
  func.func @transform_2(%arg0: i32, %arg1: i32) -> (i32, i32, i32, i32, i32) {
    %c0_i32 = arith.constant 0 : i32
    %c0_i32_0 = arith.constant 0 : i32
    %c0_i32_1 = arith.constant 0 : i32
    %c0_i32_2 = arith.constant 0 : i32
    return %arg1, %arg0, %c0_i32, %c0_i32_0, %c0_i32_1 : i32, i32, i32, i32, i32
  }
  func.func @transform_3(%arg0: i32, %arg1: i32) -> (i32, i32, i32) {
    %c0_i32 = arith.constant 0 : i32
    %c0_i32_0 = arith.constant 0 : i32
    %c0_i32_1 = arith.constant 0 : i32
    return %arg0, %c0_i32, %c0_i32_0 : i32, i32, i32
  }
  func.func @transform_4(%arg0: i32, %arg1: i32) -> (i32, i32, i32) {
    %c0_i32 = arith.constant 0 : i32
    %c0_i32_0 = arith.constant 0 : i32
    %c0_i32_1 = arith.constant 0 : i32
    return %arg0, %c0_i32, %c0_i32_0 : i32, i32, i32
  }
  func.func @transform_5(%arg0: i32, %arg1: i32) -> (i32, i32, i32) {
    %c0_i32 = arith.constant 0 : i32
    %c0_i32_0 = arith.constant 0 : i32
    %c0_i32_1 = arith.constant 0 : i32
    return %arg1, %c0_i32, %c0_i32_0 : i32, i32, i32
  }
  func.func @transform_6(%arg0: i32, %arg1: i32) -> (i32, i32, i32) {
    %c0_i32 = arith.constant 0 : i32
    %c0_i32_0 = arith.constant 0 : i32
    %c0_i32_1 = arith.constant 0 : i32
    return %arg1, %c0_i32, %c0_i32_0 : i32, i32, i32
  }
  func.func @transform_7(%arg0: i32, %arg1: i32) -> (i32, i32, i32) {
    %c0_i32 = arith.constant 0 : i32
    %c0_i32_0 = arith.constant 0 : i32
    %c0_i32_1 = arith.constant 0 : i32
    return %arg1, %c0_i32, %c0_i32_0 : i32, i32, i32
  }
  func.func @transform_8(%arg0: i32, %arg1: i32) -> (i32, i32, i32) {
    %c0_i32 = arith.constant 0 : i32
    %c0_i32_0 = arith.constant 0 : i32
    %c0_i32_1 = arith.constant 0 : i32
    return %arg1, %c0_i32, %c0_i32_0 : i32, i32, i32
  }
  func.func @transform_9(%arg0: i32, %arg1: i32) -> (i32, i32, i32) {
    %c0_i32 = arith.constant 0 : i32
    %c0_i32_0 = arith.constant 0 : i32
    %c0_i32_1 = arith.constant 0 : i32
    return %arg1, %c0_i32, %c0_i32_0 : i32, i32, i32
  }
  func.func @transform_10(%arg0: i32, %arg1: i32) -> (i32, i32, i32) {
    %c0_i32 = arith.constant 0 : i32
    %c0_i32_0 = arith.constant 0 : i32
    %c0_i32_1 = arith.constant 0 : i32
    return %arg1, %c0_i32, %c0_i32_0 : i32, i32, i32
  }
  func.func @transform_11(%arg0: i32, %arg1: i32) -> (i32, i32, i32) {
    %c0_i32 = arith.constant 0 : i32
    %c0_i32_0 = arith.constant 0 : i32
    %c0_i32_1 = arith.constant 0 : i32
    return %arg1, %c0_i32, %c0_i32_0 : i32, i32, i32
  }
  func.func @transform_12(%arg0: i32, %arg1: i32) -> (i32, i32, i32) {
    %c0_i32 = arith.constant 0 : i32
    %c0_i32_0 = arith.constant 0 : i32
    %c0_i32_1 = arith.constant 0 : i32
    return %arg1, %c0_i32, %c0_i32_0 : i32, i32, i32
  }
  func.func @transform_13(%arg0: i32, %arg1: i32) -> (i32, i32, i32) {
    %c0_i32 = arith.constant 0 : i32
    %c0_i32_0 = arith.constant 0 : i32
    %c0_i32_1 = arith.constant 0 : i32
    return %arg1, %c0_i32, %c0_i32_0 : i32, i32, i32
  }
  func.func @transform_14(%arg0: i32, %arg1: i32) -> (i32, i32, i32) {
    %c0_i32 = arith.constant 0 : i32
    %c0_i32_0 = arith.constant 0 : i32
    %c0_i32_1 = arith.constant 0 : i32
    return %arg1, %c0_i32, %c0_i32_0 : i32, i32, i32
  }
  func.func @transform_15(%arg0: i32, %arg1: i32) -> (i32, i32, i32) {
    %c0_i32 = arith.constant 0 : i32
    %c0_i32_0 = arith.constant 0 : i32
    %c0_i32_1 = arith.constant 0 : i32
    return %arg1, %c0_i32, %c0_i32_0 : i32, i32, i32
  }
  func.func @transform_16(%arg0: i32, %arg1: i32) -> (i32, i32, i32) {
    %c0_i32 = arith.constant 0 : i32
    %c0_i32_0 = arith.constant 0 : i32
    %c0_i32_1 = arith.constant 0 : i32
    return %arg1, %c0_i32, %c0_i32_0 : i32, i32, i32
  }
  func.func @transform_17(%arg0: i32, %arg1: i32) -> (i32, i32, i32) {
    %c0_i32 = arith.constant 0 : i32
    %c0_i32_0 = arith.constant 0 : i32
    %c0_i32_1 = arith.constant 0 : i32
    return %arg1, %c0_i32, %c0_i32_0 : i32, i32, i32
  }
  func.func @transform_18(%arg0: i32, %arg1: i32) -> (i32, i32, i32) {
    %c0_i32 = arith.constant 0 : i32
    %c0_i32_0 = arith.constant 0 : i32
    %c0_i32_1 = arith.constant 0 : i32
    return %arg1, %c0_i32, %c0_i32_0 : i32, i32, i32
  }
  func.func @transform_19(%arg0: i32, %arg1: i32) -> (i32, i32, i32, i32) {
    %c0_i32 = arith.constant 0 : i32
    %c0_i32_0 = arith.constant 0 : i32
    %c0_i32_1 = arith.constant 0 : i32
    return %arg1, %arg0, %c0_i32, %c0_i32_0 : i32, i32, i32, i32
  }
}

</mosaic_0001>

<bundles_post_ra>
// kernel: transformer_decoder_forward.1
= control target key start
LH: loop header
LB: loop body
LE: loop exit
PB: predicated region body
PF: predicated region fallthrough
CT: control target
= control target key end

     0   :  { %s2614_s30 = smov 0   ;;  %s2616_s20 = smov 0   ;;  %s2970_s0 = inlined_call_operand.vmem [shape: f32[2,8,32], index: 0, kind: input, shape index: {}]   ;;  %s2971_s1 = inlined_call_operand.vmem [shape: bf16[2,2,4,12,8], index: 1, kind: input, shape index: {}]   ;;  %s2972_s2 = inlined_call_operand.vmem [shape: bf16[2,2,4,12,8], index: 2, kind: input, shape index: {}]   ;;  %s2973_s3 = inlined_call_operand.vmem [shape: f32[2,1,8], index: 3, kind: input, shape index: {}]   ;;  %s2974_s4 = inlined_call_operand.vmem [shape: f32[2,1,12], index: 4, kind: input, shape index: {}]   ;;  %s2975_s5 = inlined_call_operand.vmem [shape: bf16[2,32,96], index: 5, kind: input, shape index: {}]   ;;  %s2976_s6 = inlined_call_operand.vmem [shape: f32[2,1,96], index: 6, kind: input, shape index: {}]   ;;  %s2977_s7 = inlined_call_operand.vmem [shape: bf16[2,32,32], index: 7, kind: input, shape index: {}]   ;;  %s2978_s8 = inlined_call_operand.vmem [shape: f32[2,1,32], index: 8, kind: input, shape index: {}]   ;;  %s2979_s9 = inlined_call_operand.vmem [shape: bf16[2,32,32], index: 9, kind: input, shape index: {}]   ;;  %s2980_s10 = inlined_call_operand.vmem [shape: f32[2,1,32], index: 10, kind: input, shape index: {}]   ;;  %s2981_s11 = inlined_call_operand.vmem [shape: bf16[2,32,32], index: 11, kind: input, shape index: {}]   ;;  %s2982_s12 = inlined_call_operand.vmem [shape: f32[2,1,32], index: 12, kind: input, shape index: {}]   ;;  %s2983_s13 = inlined_call_operand.vmem [shape: bf16[2,32,64], index: 13, kind: input, shape index: {}]   ;;  %s2984_s14 = inlined_call_operand.vmem [shape: f32[2,1,64], index: 14, kind: input, shape index: {}]   ;;  %s2985_s15 = inlined_call_operand.vmem [shape: bf16[2,64,32], index: 15, kind: input, shape index: {}]   ;;  %s2986_s16 = inlined_call_operand.vmem [shape: f32[2,1,32], index: 16, kind: input, shape index: {}]   ;;  %s2987_s17 = inlined_call_operand.vmem [shape: f32[2,3,32], index: 17, kind: input, shape index: {}]   ;;  %s2988_s18 = inlined_call_operand.vmem [shape: f32[2,3,32], index: 18, kind: input, shape index: {}]   ;;  %s2989_s19 = inlined_call_operand.vmem [shape: f32[2,2,8,32], index: 19, kind: output, shape index: {}]  }
   0x1   :  { %2997 = sst [smem:[#allocation16_spill]] %s2970_s0  ;;  %s2612_s0 = smov 0  }
   0x2   :  { %2998 = sst [smem:[#allocation17_spill]] %s2971_s1  ;;  %s2618_s21 = smov 0  }
   0x3   :  { %2999 = sst [smem:[#allocation18_spill]] %s2972_s2  ;;  %s2620_s1 = smov 0  }
   0x4   :  { %3000 = sst [smem:[#allocation19_spill]] %s2973_s3 }
   0x5   :  { %3001 = sst [smem:[#allocation20_spill]] %s2974_s4 }
   0x6   :  { %3002 = sst [smem:[#allocation21_spill]] %s2975_s5 }
   0x7   :  { %3003 = sst [smem:[#allocation22_spill]] %s2977_s7 }
   0x8   :  { %3004 = sst [smem:[#allocation23_spill]] %s2979_s9 }
   0x9   :  { %3005 = sst [smem:[#allocation24_spill]] %s2981_s11 }
   0xa   :  { %3006 = sst [smem:[#allocation25_spill]] %s2982_s12 }
   0xb   :  { %3007 = sst [smem:[#allocation26_spill]] %s2983_s13 }
   0xc   :  { %3008 = sst [smem:[#allocation27_spill]] %s2984_s14 }
   0xd   :  { %3009 = sst [smem:[#allocation28_spill]] %s2985_s15 }
   0xe   :  { %3010 = sst [smem:[#allocation29_spill]] %s2986_s16 }
   0xf   :  { %3011 = sst [smem:[#allocation30_spill]] %s2987_s17 }
  0x10   :  { %3012 = sst [smem:[#allocation31_spill]] %s2988_s18 }
  0x11   :  { %3013 = sst [smem:[#allocation32_spill]] %s2989_s19 }
  0x12 LB: > { %3014 = sst [smem:[#allocation7_spill]] %s2479_s0  ;;  %s38_s22 = sadd.s32 1, %s2487_s20  ;;  %s2495_s1 = sphi %s2620_s1, %s29_s1   ;;  %s2491_s21 = sphi %s2618_s21, %s3060_s21   ;;  %s2487_s20 = sphi %s2616_s20, %s3059_s20   ;;  %s2483_s30 = sphi %s2614_s30, %s3058_s30   ;;  %s2479_s0 = sphi %s2612_s0, %s3057_s0  }
  0x13   : > { %3015 = sst [smem:[#allocation8_spill]] %s2487_s20  ;;  %s41_s2 = sadd.s32 1, %s2491_s21 }
  0x14   : > { %3016 = sst [smem:[#allocation9_spill]] %s2491_s21  ;;  %p39_p0 = scmp.ge.s32.totalorder %s38_s22, 2 }
  0x15   : > { %3017 = sst [smem:[#allocation10_spill]] %s2495_s1  ;;  %p2189_p1 = scmp.ge.s32.totalorder %s2495_s1, 1 }
  0x16   : > { %p724_p2 = scmp.lt.s32.totalorder %s2495_s1, 5  ;;  %s3062_s22 = smov (%p39_p0, %s38_s22), 0 }
  0x17   : > { %3018 = sst [smem:[#allocation11_spill]] %s3062_s22  ;;  %s3064_s2 = smov (!%p39_p0, %s41_s2), %s2491_s21 }
  0x18   : > { %p725_p3 = pnand %p2189_p1, %p724_p2  ;;  %p43_p4 = scmp.ge.s32.totalorder %s3064_s2, 2 }
  0x1a   : > { %s3066_s2 = smov (%p43_p4, %s3064_s2), 0  ;;  %728 = sbr.rel (%p725_p3) target bundleno = 3225 (0xc99), region = 96 }
  0x1b   : > { %3019 = sst [smem:[#allocation12_spill]] %s3066_s2 }
  0x1f   : > { %p862_p5 = scmp.lt.s32.totalorder %s2483_s30, 1  ;;  %p866_p6 = scmp.lt.s32.totalorder %s2479_s0, 1 }
  0x20   : > { %s3021_s2 = sld [smem:[#allocation16_spill]] }
  0x21   : > { %s3068_s30 = smov (!%p862_p5, %s2483_s30), 1  ;;  %s3023_s5 = sld [smem:[#allocation21_spill]] }
  0x22   : > { %s2648_s23 = scalar_select %p866_p6, %s2479_s0, 1 }
  0x23   : > { %s2190_s24 = sshll.u32 %s3068_s30, 3  ;;  %s3024_s27 = sld [smem:[#allocation17_spill]] }
  0x24   : > { %s2192_s21 = sshll.u32 %s2648_s23, 4  ;;  %s3027_s7 = sld [smem:[#allocation22_spill]] }
  0x25   : > { %s872_s20 = sadd.s32 %s2192_s21, %s2190_s24  ;;  %s3028_s9 = sld [smem:[#allocation23_spill]] }
  0x26   : > { %s865_s22 = scalar_lea.vmem %s3021_s2, %s2190_s24  ;;  %s2193_s18 = sshll.u32 %s872_s20, 2 }
  0x27   : > { %s894_s25 = scalar_lea.vmem %s3023_s5, %s2192_s21  ;;  %s3025_s24 = sld [smem:[#allocation18_spill]] }
  0x28   : > { %s3029_s11 = sld [smem:[#allocation24_spill]]  ;;  %s2209_s19 = sshll.u32 %s2648_s23, 2 }
  0x29   : > { %s2669_s2 = scalar_lea.vmem %s3024_s27, %s2193_s18  ;;  %s3032_s13 = sld [smem:[#allocation26_spill]] }
  0x2a   : > { %s2683_s16 = scalar_lea.vmem %s3027_s7, %s2192_s21  ;;  %s2211_s7 = sshll.u32 %s2648_s23, 1 }
  0x2b   : > { %s2692_s28 = scalar_lea.vmem %s3028_s9, %s2192_s21  ;;  %s3038_s26 = sld [smem:[#allocation31_spill]] }
  0x2c   : > { %s951_s14 = sadd.s32 %s2211_s7, %s3068_s30  ;;  %s3039_s29 = sld [smem:[#allocation32_spill]] }
  0x2d   : > { %s2674_s15 = scalar_lea.vmem %s3025_s24, %s2193_s18  ;;  %s2331_s18 = sshll.u32 %s2648_s23, 5 }
  0x2e   : > { %3026 = sst [smem:[#allocation13_spill]] %s2674_s15  ;;  %s2701_s4 = scalar_lea.vmem %s3029_s11, %s2192_s21 }
  0x2f   : > { %3030 = sst [smem:[#allocation14_spill]] %s2701_s4  ;;  %s2710_s27 = scalar_lea.vmem %s3032_s13, %s2192_s21 }
  0x30   : > { %s3034_s15 = sld [smem:[#allocation28_spill]]  ;;  %s2212_s24 = sshll.u32 %s951_s14, 3 }
  0x31   : > { %s3036_s4 = sld [smem:[#allocation29_spill]]  ;;  %s2736_s9 = scalar_lea.vmem %s3038_s26, %s2209_s19 }
  0x32   : > { %s3037_s21 = sld [smem:[#allocation30_spill]] }
  0x33   : > { %s3040_s11 = sld [smem:[#allocation7_spill]] }
  0x36   : > { %s2720_s0 = scalar_lea.vmem %s3034_s15, %s2331_s18 }
  0x37   : > { %3035 = sst [smem:[#allocation15_spill]] %s2720_s0  ;;  %s937_s20 = scalar_lea.vmem %s3036_s4, %s2648_s23 }
  0x38   : > { %s2731_s3 = scalar_lea.vmem %s3037_s21, %s2209_s19  ;;  %s2742_s0 = scalar_lea.vmem %s3039_s29, %s2212_s24 }
  0x39   : > { %p2213_p7 = scmp.ne.s32.totalorder %s3040_s11, 0 }
  0x3b   : > { %958 = sbr.rel (%p2213_p7) target bundleno = 66 (0x42), region = 100 }
  0x40   : > { %v959_v0 = vld [vmem:[%s865_s22] sm:$0xff]  ;;  %vm960_vm0 = vcmask 261120  }
  0x41   : > { %961 = vst.msk [vmem:[#allocation2] sm:$0xff] %vm960_vm0, %v959_v0 }
  0x42 PF: > { %v2333_v1 = vld [vmem:[%s894_s25 + $0x8] sm:$0xff]  ;;  %v2332_v2 = vld [vmem:[%s894_s25] sm:$0xff]  ;;  %vm988_vm1 = vcmask 261120   ;;  %s3041_s13 = scalar_lea.vmem %s2976_s6, %s2648_s23  ;;  %vm1006_vm2 = vcmask 60416   ;;  %s2497_s14 = smov 72   ;;  %vm1082_vm3 = vcmask 64512  }
  0x43   : > { %998 = vmatpush.bf16.msra.mxu0 %v2333_v1  ;;  %v2409_v5 = vld [vmem:[%s3041_s13] ss:$0 sm:$0xff]  ;;  %s2498_s22 = smov 120   ;;  %s2499_s25 = smov 88   ;;  %vm1210_vm4 = vcmask 1043456   ;;  %vm1291_vm5 = vcmask 126016  }
  0x44   : > { %s2500_s4 = smov 104   ;;  %s2501_s1 = smov 112   ;;  %vm1298_vm6 = vcmask 191616   ;;  %vm1305_vm7 = vcmask 257216   ;;  %vm1549_vm12 = vcmask 97280   ;;  %vm1606_vm13 = vcmask 1045504  }
  0x45   : > { %s2502_s19 = smov 80   ;;  %s2503_s17 = smov 96  }
  0x46   : > { %s3042_s26 = sld [smem:[#allocation19_spill]]  ;;  %s2504_s15 = smov 48  }
  0x47   : > { %999 = vmatpush.bf16.msra.mxu0 %v2332_v2  ;;  %s2505_s18 = smov 64   ;;  %s2506_s29 = smov 56  }
  0x48   : > { %v2745_v3 = vld [vmem:[#allocation2] sm:$0xff]  ;;  %s2507_s11 = smov 40   ;;  %s2508_s7 = smov 8  }
  0x49   : > { %v967_v4 = vpack.c.bf16 %v2745_v3, %v2745_v3  ;;  %s2509_s12 = smov 16   ;;  %s2510_s13 = smov 24  }
  0x4a   : > { %s3050_s5 = sld [smem:[#allocation25_spill]] }
  0x4b   : > { %2222 = vmatmul.msk.bf16.vlgmr.msra.gmra.mxu0 %vm988_vm1, %v967_v4 }
  0x4c   : > { %s3043_s24 = scalar_lea.vmem %s3042_s26, %s3068_s30 }
  0x4d   : > { %v2410_v29 = vld [vmem:[%s3043_s24] ss:$0 sm:$0xff]  ;;  %s3052_s24 = sld [smem:[#allocation15_spill]] }
  0x50   : > { %s3051_s26 = scalar_lea.vmem %s3050_s5, %s2648_s23 }
  0xc8   : > { %v1001_v6 = vpop.f32.mrf.mxu0 }
  0xc9   : > { %v1002_v7 = vadd.f32 %v2409_v5, %v1001_v6 }
  0xcb   : > { %v2755_v8 = vpack.c.bf16 %v1002_v7, %v1002_v7 }
  0xcd   : > { %1052 = vrot.lane.b32.xlu2 %v2755_v8, %s2497_s14  ;;  %1017 = vrot.lane.b32.xlu1 %v2755_v8, %s2498_s22  ;;  %1007 = vst.msk [vmem:[#allocation3] sm:$0xf] %vm1006_vm2, %v2755_v8 }
  0xce   : > { %1022 = vrot.lane.b32.xlu0 %v2755_v8, %s2499_s25 }
  0xd0   : > { %v1003_v9 = vpop.f32.mrf.mxu0 }
  0xd4   : > { %v1075_v28 = vld [vmem:[#allocation3] sm:$0xf] }
  0xd5   : > { %1047 = vrot.lane.b32.xlu2 %v2755_v8, %s2500_s4  ;;  %1032 = vrot.lane.b32.xlu1 %v2755_v8, %s2501_s1 }
  0xd6   : > { %1037 = vrot.lane.b32.xlu0 %v2755_v8, %s2502_s19  ;;  %s3049_s19 = sld [smem:[#allocation14_spill]] }
  0xde   : > { %1009 = vrot.lane.b32.xlu0 %v2755_v8, %s2503_s17 }
 0x127   : > { %v1053_v10 = vpop.permute.xlu2 %1052 }
 0x128   : > { %1056 = vst.msk [vmem:[#allocation4 + $0xc] sm:$0xf] %vm1006_vm2, %v1053_v10 }
 0x12f   : > { %v1048_v11 = vpop.permute.xlu2 %1047  ;;  %v1065_v12 = vld [vmem:[#allocation4 + $0xc] sm:$0xf] }
 0x130   : > { %1051 = vst.msk [vmem:[#allocation3 + $0xc] sm:$0xf] %vm1006_vm2, %v1048_v11  ;;  %v1144_v13 = vsel %vm1082_vm3, %v1065_v12, 0 }
 0x131   : > { %1153 = vmatpush.bf16.xpose.msrb.mxu0 %v1144_v13 }
 0x137   : > { %v1078_v14 = vld [vmem:[#allocation3 + $0xc] sm:$0xf] }
 0x138   : > { %2226 = vmatmul.msk.bf16.vlgmr.msrb.gmra.mxu0 %vm1082_vm3, %v1078_v14 }
 0x13f   : > { %v1018_v15 = vpop.permute.xlu1 %1017 }
 0x140   : > { %1021 = vst.msk [vmem:[#allocation3 + $0x4] sm:$0xf] %vm1006_vm2, %v1018_v15  ;;  %v1023_v16 = vpop.permute.xlu0 %1022 }
 0x141   : > { %1026 = vst.msk [vmem:[#allocation4 + $0x4] sm:$0xf] %vm1006_vm2, %v1023_v16 }
 0x147   : > { %v1033_v17 = vpop.permute.xlu1 %1032  ;;  %v1076_v22 = vld [vmem:[#allocation3 + $0x4] sm:$0xf] }
 0x148   : > { %1036 = vst.msk [vmem:[#allocation3 + $0x8] sm:$0xf] %vm1006_vm2, %v1033_v17  ;;  %v1038_v18 = vpop.permute.xlu0 %1037  ;;  %v1063_v19 = vld [vmem:[#allocation4 + $0x4] sm:$0xf] }
 0x149   : > { %1041 = vst.msk [vmem:[#allocation4 + $0x8] sm:$0xf] %vm1006_vm2, %v1038_v18  ;;  %v1106_v20 = vsel %vm1082_vm3, %v1063_v19, 0 }
 0x14a   : > { %1115 = vmatpush.bf16.xpose.msra.mxu2 %v1106_v20 }
 0x14f   : > { %v1077_v25 = vld [vmem:[#allocation3 + $0x8] sm:$0xf] }
 0x150   : > { %v1010_v21 = vpop.permute.xlu0 %1009  ;;  %v1064_v23 = vld [vmem:[#allocation4 + $0x8] sm:$0xf] }
 0x151   : > { %1012 = vst.msk [vmem:[#allocation4] sm:$0xf] %vm1006_vm2, %v1010_v21  ;;  %2224 = vmatmul.msk.bf16.vlgmr.msra.gmra.mxu2 %vm1082_vm3, %v1076_v22  ;;  %v1125_v24 = vsel %vm1082_vm3, %v1064_v23, 0 }
 0x152   : > { %1134 = vmatpush.bf16.xpose.msra.mxu3 %v1125_v24 }
 0x158   : > { %v1062_v26 = vld [vmem:[#allocation4] sm:$0xf] }
 0x159   : > { %2225 = vmatmul.msk.bf16.vlgmr.msra.gmra.mxu3 %vm1082_vm3, %v1077_v25  ;;  %v1087_v27 = vsel %vm1082_vm3, %v1062_v26, 0 }
 0x15a   : > { %1096 = vmatpush.bf16.xpose.msra.mxu1 %v1087_v27 }
 0x161   : > { %2223 = vmatmul.msk.bf16.vlgmr.msra.gmra.mxu1 %vm1082_vm3, %v1075_v28 }
 0x1b5   : > { %v1155_v30 = vpop.f32.mrf.mxu0 }
 0x1b6   : > { %v1156_v31 = vadd.f32 %v2410_v29, %v1155_v30 }
 0x1b8   : > { %v1168_v32 = vsel %vm1082_vm3, %v1156_v31, -inf }
 0x1b9   : > { %1169 = vmax.xlane.f32.xlu0 %v1168_v32 }
 0x1bd   : > { %v1157_v33 = vpop.f32.mrf.mxu0 }
 0x1cd   : > { %1042 = vrot.lane.b32.xlu0 %v2755_v8, %s2504_s15 }
 0x1d4   : > { %v1117_v34 = vpop.f32.mrf.mxu2 }
 0x1d5   : > { %v1118_v35 = vadd.f32 %v2410_v29, %v1117_v34  ;;  %1013 = vrot.lane.b32.xlu0 %v2755_v8, %s2505_s18  ;;  %s3053_s18 = sld [smem:[#allocation27_spill]] }
 0x1d7   : > { %v1162_v36 = vsel %vm1082_vm3, %v1118_v35, -inf }
 0x1d8   : > { %1163 = vmax.xlane.f32.xlu1 %v1162_v36 }
 0x1dc   : > { %v1119_v37 = vpop.f32.mrf.mxu2  ;;  %v1136_v38 = vpop.f32.mrf.mxu3 }
 0x1dd   : > { %v1137_v39 = vadd.f32 %v2410_v29, %v1136_v38 }
 0x1de   : > { %v1098_v40 = vpop.f32.mrf.mxu1 }
 0x1df   : > { %v1165_v41 = vsel %vm1082_vm3, %v1137_v39, -inf  ;;  %v1099_v42 = vadd.f32 %v2410_v29, %v1098_v40 }
 0x1e0   : > { %1166 = vmax.xlane.f32.xlu2 %v1165_v41 }
 0x1e1   : > { %v1159_v45 = vsel %vm1082_vm3, %v1099_v42, -inf }
 0x1e4   : > { %v1138_v43 = vpop.f32.mrf.mxu3 }
 0x1e5   : > { %v2335_v43 = vld [vmem:[%s2683_s16 + $0x8] sm:$0xff] }
 0x1e6   : > { %v1100_v44 = vpop.f32.mrf.mxu1 }
 0x1e7   : > { %v2334_v44 = vld [vmem:[%s2683_s16] sm:$0xff]  ;;  %s3044_s16 = scalar_lea.vmem %s2978_s8, %s2648_s23 }
 0x1e8   : > { %1160 = vmax.xlane.f32.xlu2 %v1159_v45 }
 0x1f1   : > { %1027 = vrot.lane.b32.xlu1 %v2755_v8, %s2506_s29  ;;  %s3054_s29 = scalar_lea.vmem %s3053_s18, %s2648_s23 }
 0x22c   : > { %v1170_v46 = vpop.xlane.xlu0 %1169 }
 0x22d   : > { %v1174_v47 = vsub.f32 %v1156_v31, %v1170_v46 }
 0x22f   : > { %v1181_v48 = vmul.f32 1.442695, %v1174_v47 }
 0x231   : > { %2417 = vpow2.f32 %v1181_v48 }
 0x237   : > { %v2418_v49 = vpop.eup %2417 }
 0x238   : > { %v1192_v50 = vsel %vm1082_vm3, %v2418_v49, 0.0 }
 0x239   : > { %1193 = vadd.xlane.f32.xlu1 %v1192_v50 }
 0x23f   : > { %v1043_v51 = vpop.permute.xlu0 %1042 }
 0x240   : > { %1046 = vst.msk [vmem:[#allocation5 + $0x8] sm:$0xf] %vm1006_vm2, %v1043_v51 }
 0x247   : > { %v1014_v52 = vpop.permute.xlu0 %1013  ;;  %v1068_v53 = vld [vmem:[#allocation5 + $0x8] sm:$0xf] }
 0x248   : > { %1016 = vst.msk [vmem:[#allocation5] sm:$0xf] %vm1006_vm2, %v1014_v52  ;;  %v1250_v54 = vsel %vm1210_vm4, %v1068_v53, 0 }
 0x249   : > { %1259 = vmatpush.bf16.msrb.mxu3 %v1250_v54 }
 0x24b   : > { %v1164_v55 = vpop.xlane.xlu1 %1163 }
 0x24c   : > { %v1172_v56 = vsub.f32 %v1118_v35, %v1164_v55  ;;  %v2511_v55 = vmov 32.0  }
 0x24e   : > { %v1177_v57 = vmul.f32 1.442695, %v1172_v56 }
 0x24f   : > { %v1066_v58 = vld [vmem:[#allocation5] sm:$0xf] }
 0x250   : > { %2419 = vpow2.f32 %v1177_v57  ;;  %v1212_v59 = vsel %vm1210_vm4, %v1066_v58, 0 }
 0x251   : > { %1221 = vmatpush.bf16.msrb.mxu1 %v1212_v59 }
 0x253   : > { %v1167_v60 = vpop.xlane.xlu2 %1166 }
 0x254   : > { %v1173_v61 = vsub.f32 %v1137_v39, %v1167_v60 }
 0x255   : > { %1332 = vmatpush.bf16.msra.mxu1 %v2335_v43 }
 0x256   : > { %v2420_v62 = vpop.eup %2419  ;;  %v1179_v63 = vmul.f32 1.442695, %v1173_v61 }
 0x257   : > { %v1186_v0 = vsel %vm1082_vm3, %v2420_v62, 0.0 }
 0x258   : > { %2421 = vpow2.f32 %v1179_v63  ;;  %1187 = vadd.xlane.f32.xlu2 %v1186_v0 }
 0x259   : > { %1333 = vmatpush.bf16.msra.mxu1 %v2334_v44 }
 0x25b   : > { %v1161_v1 = vpop.xlane.xlu2 %1160 }
 0x25c   : > { %v1171_v2 = vsub.f32 %v1099_v42, %v1161_v1 }
 0x25e   : > { %v2422_v4 = vpop.eup %2421  ;;  %v1175_v5 = vmul.f32 1.442695, %v1171_v2  ;;  %v2337_v2 = vld [vmem:[%s2692_s28 + $0x8] sm:$0xff] }
 0x25f   : > { %v1189_v6 = vsel %vm1082_vm3, %v2422_v4, 0.0 }
 0x260   : > { %2423 = vpow2.f32 %v1175_v5  ;;  %1190 = vadd.xlane.f32.xlu2 %v1189_v6 }
 0x263   : > { %v1028_v7 = vpop.permute.xlu1 %1027 }
 0x264   : > { %1031 = vst.msk [vmem:[#allocation5 + $0x4] sm:$0xf] %vm1006_vm2, %v1028_v7 }
 0x266   : > { %v2424_v9 = vpop.eup %2423 }
 0x267   : > { %v1183_v10 = vsel %vm1082_vm3, %v2424_v9, 0.0 }
 0x268   : > { %1184 = vadd.xlane.f32.xlu0 %v1183_v10 }
 0x26b   : > { %v1067_v11 = vld [vmem:[#allocation5 + $0x4] sm:$0xf] }
 0x26c   : > { %v1231_v12 = vsel %vm1210_vm4, %v1067_v11, 0 }
 0x26d   : > { %1240 = vmatpush.bf16.msrb.mxu2 %v1231_v12 }
 0x271   : > { %1403 = vmatpush.bf16.msra.mxu2 %v2337_v2 }
 0x278   : > { %1057 = vrot.lane.b32.xlu2 %v2755_v8, %s2507_s11 }
 0x2ac   : > { %v1194_v18 = vpop.xlane.xlu1 %1193 }
 0x2cb   : > { %v1188_v13 = vpop.xlane.xlu2 %1187 }
 0x2cc   : > { %2425 = vrcp.f32 %v1188_v13  ;;  %v2838_v13 = vld [vmem:[%s2731_s3] sm:$0x7]  ;;  %s3045_s3 = scalar_lea.vmem %s2980_s10, %s2648_s23 }
 0x2d2   : > { %v2426_v14 = vpop.eup %2425 }
 0x2d3   : > { %v1200_v15 = vmul.f32 %v2426_v14, %v2420_v62  ;;  %v1191_v16 = vpop.xlane.xlu2 %1190 }
 0x2d4   : > { %2427 = vrcp.f32 %v1191_v16 }
 0x2d5   : > { %v1204_v17 = vpack.c.bf16 %v1200_v15, %v1200_v15  ;;  %2429 = vrcp.f32 %v1194_v18  ;;  %v2841_v15 = vld [vmem:[%s2736_s9] sm:$0x7] }
 0x2d7   : > { %2228 = vmatmul.msk.bf16.vlgmr.msrb.gmra.mxu2 %vm1082_vm3, %v1204_v17  ;;  %v1369_v17 = vperm.slane %v2838_v13, 0 }
 0x2da   : > { %v2428_v19 = vpop.eup %2427 }
 0x2db   : > { %v1201_v20 = vmul.f32 %v2428_v19, %v2422_v4  ;;  %v1185_v21 = vpop.xlane.xlu0 %1184  ;;  %v1058_v22 = vpop.permute.xlu2 %1057  ;;  %v2336_v4 = vld [vmem:[%s2692_s28] sm:$0xff]  ;;  %v1371_v19 = vperm.slane %v2841_v15, 0 }
 0x2dc   : > { %2431 = vrcp.f32 %v1185_v21  ;;  %1061 = vst.msk [vmem:[#allocation5 + $0xc] sm:$0xf] %vm1006_vm2, %v1058_v22  ;;  %v2430_v8 = vpop.eup %2429  ;;  %1404 = vmatpush.bf16.msra.mxu2 %v2336_v4 }
 0x2dd   : > { %v1205_v23 = vpack.c.bf16 %v1201_v20, %v1201_v20  ;;  %v1202_v25 = vmul.f32 %v2430_v8, %v2418_v49  ;;  %v2411_v49 = vld [vmem:[%s3044_s16] ss:$0 sm:$0xff]  ;;  %2433 = vrcp.f32 %v2511_v55 }
 0x2de   : > { %v2251_v8 = vld [vmem:[%s2669_s2] sm:$0xf] }
 0x2df   : > { %2229 = vmatmul.msk.bf16.vlgmr.msrb.gmra.mxu3 %vm1082_vm3, %v1205_v23  ;;  %v1206_v30 = vpack.c.bf16 %v1202_v25, %v1202_v25 }
 0x2e2   : > { %v2432_v24 = vpop.eup %2431 }
 0x2e3   : > { %v1199_v26 = vmul.f32 %v2432_v24, %v2424_v9  ;;  %v1069_v27 = vld [vmem:[#allocation5 + $0xc] sm:$0xf]  ;;  %v2434_v56 = vpop.eup %2433  ;;  %v2338_v24 = vld [vmem:[%s2669_s2] sm:$0x30] }
 0x2e4   : > { %v1269_v28 = vsel %vm1210_vm4, %v1069_v27, 0  ;;  %v1344_v57 = vmul.f32 32.0, %v2434_v56  ;;  %vm1348_vm8 = vweird.f32 %v2434_v56  ;;  %v2252_v25 = vor.u32 %v2338_v24, %v2251_v8  ;;  %v2412_v27 = vld [vmem:[%s3045_s3] ss:$0 sm:$0xff] }
 0x2e5   : > { %1278 = vmatpush.bf16.msra.mxu0 %v1269_v28  ;;  %v1203_v29 = vpack.c.bf16 %v1199_v26, %v1199_v26 }
 0x2e6   : > { %v1345_v58 = vsub.f32 1.0, %v1344_v57  ;;  %v1462_v26 = vsel %vm1082_vm3, %v2252_v25, 0 }
 0x2e7   : > { %2227 = vmatmul.msk.bf16.vlgmr.msrb.gmra.mxu1 %vm1082_vm3, %v1203_v29  ;;  %1471 = vmatpush.bf16.xpose.msra.mxu3 %v1462_v26 }
 0x2e8   : > { %2230 = vmatmul.msk.bf16.vlgmr.msra.gmra.mxu0 %vm1082_vm3, %v1206_v30  ;;  %v1346_v59 = vmul.f32 %v2434_v56, %v1345_v58 }
 0x2ea   : > { %v1347_v60 = vadd.f32 %v2434_v56, %v1346_v59 }
 0x2ec   : > { %v2830_v61 = vsel %vm1348_vm8, %v2434_v56, %v1347_v60 }
 0x35a   : > { %v1242_v31 = vpop.f32.mrf.mxu2 }
 0x35b   : > { %v1286_v32 = vpack.c.bf16 %v1242_v31, %v1242_v31 }
 0x35d   : > { %1288 = vrot.lane.b32.xlu2 %v1286_v32, %s2508_s7 }
 0x362   : > { %v1244_v33 = vpop.f32.mrf.mxu2  ;;  %v1261_v34 = vpop.f32.mrf.mxu3 }
 0x363   : > { %v1293_v35 = vpack.c.bf16 %v1261_v34, %v1261_v34  ;;  %v2266_v33 = vld [vmem:[%s2669_s2 + $0x18] sm:$0xf]  ;;  %v2341_v34 = vld [vmem:[%s2669_s2 + $0x18] sm:$0x30] }
 0x364   : > { %v1223_v36 = vpop.f32.mrf.mxu1 }
 0x365   : > { %v1284_v37 = vpack.c.bf16 %v1223_v36, %v1223_v36  ;;  %1295 = vrot.lane.b32.xlu2 %v1293_v35, %s2509_s12  ;;  %v1280_v38 = vpop.f32.mrf.mxu0  ;;  %v2256_v35 = vld [vmem:[%s2669_s2 + $0x8] sm:$0xf]  ;;  %v2267_v36 = vor.u32 %v2341_v34, %v2266_v33 }
 0x366   : > { %v1300_v40 = vpack.c.bf16 %v1280_v38, %v1280_v38 }
 0x367   : > { %1285 = vst.msk [vmem:[#allocation6] sm:$0xf] %vm1006_vm2, %v1284_v37  ;;  %v2339_v37 = vld [vmem:[%s2669_s2 + $0x8] sm:$0x30] }
 0x368   : > { %v2257_v38 = vor.u32 %v2339_v37, %v2256_v35 }
 0x36a   : > { %v1263_v39 = vpop.f32.mrf.mxu3 }
 0x36b   : > { %v1534_v39 = vsel %vm1082_vm3, %v2267_v36, 0 }
 0x36c   : > { %v1225_v41 = vpop.f32.mrf.mxu1  ;;  %1543 = vmatpush.bf16.xpose.msrb.mxu2 %v1534_v39 }
 0x36d   : > { %1302 = vrot.lane.b32.xlu2 %v1300_v40, %s2510_s13  ;;  %v1282_v42 = vpop.f32.mrf.mxu0  ;;  %v1486_v40 = vsel %vm1082_vm3, %v2257_v38, 0  ;;  %v2261_v41 = vld [vmem:[%s2669_s2 + $0x10] sm:$0xf] }
 0x36e   : > { %1495 = vmatpush.bf16.xpose.msrb.mxu0 %v1486_v40  ;;  %v2340_v42 = vld [vmem:[%s2669_s2 + $0x10] sm:$0x30] }
 0x36f   : > { %v2262_v43 = vor.u32 %v2340_v42, %v2261_v41 }
 0x371   : > { %v1510_v44 = vsel %vm1082_vm3, %v2262_v43, 0 }
 0x372   : > { %1519 = vmatpush.bf16.xpose.msrb.mxu1 %v1510_v44 }
 0x3b7   : > { %v1289_v45 = vpop.permute.xlu2 %1288 }
 0x3b8   : > { %1292 = vst.msk [vmem:[#allocation6] sm:$0xf] %vm1291_vm5, %v1289_v45 }
 0x3bf   : > { %v1296_v46 = vpop.permute.xlu2 %1295 }
 0x3c0   : > { %1299 = vst.msk [vmem:[#allocation6] sm:$0xf] %vm1298_vm6, %v1296_v46 }
 0x3c7   : > { %v1303_v47 = vpop.permute.xlu2 %1302 }
 0x3c8   : > { %1306 = vst.msk [vmem:[#allocation6] sm:$0xf] %vm1305_vm7, %v1303_v47 }
 0x3cf   : > { %v1307_v48 = vld [vmem:[#allocation6] sm:$0xf] }
 0x3d0   : > { %2239 = vmatmul.msk.bf16.vlgmr.msra.gmra.mxu1 %vm988_vm1, %v1307_v48 }
 0x44d   : > { %v1335_v50 = vpop.f32.mrf.mxu1 }
 0x44e   : > { %v1336_v51 = vadd.f32 %v2411_v49, %v1335_v50 }
 0x450   : > { %v1339_v52 = vadd.f32 %v1336_v51, %v2745_v3 }
 0x452   : > { %v1340_v53 = vsel %vm988_vm1, %v1339_v52, 0.0 }
 0x453   : > { %1341 = vadd.xlane.f32.xlu1 %v1340_v53 }
 0x455   : > { %v1337_v54 = vpop.f32.mrf.mxu1 }
 0x4c6   : > { %v1342_v62 = vpop.xlane.xlu1 %1341 }
 0x4c7   : > { %v1350_v63 = vmul.f32 %v2830_v61, %v1342_v62 }
 0x4c9   : > { %v1351_v3 = vsub.f32 %v1339_v52, %v1350_v63 }
 0x4cb   : > { %v1352_v0 = vmul.f32 %v1351_v3, %v1351_v3 }
 0x4cd   : > { %v1353_v1 = vsel %vm988_vm1, %v1352_v0, 0.0 }
 0x4ce   : > { %1354 = vadd.xlane.f32.xlu2 %v1353_v1 }
 0x541   : > { %v1355_v5 = vpop.xlane.xlu2 %1354 }
 0x542   : > { %v1356_v6 = vmul.f32 %v1355_v5, %v2830_v61 }
 0x544   : > { %v1357_v7 = vadd.f32 1e-05, %v1356_v6 }
 0x546   : > { %2435 = vrsqrt.f32 %v1357_v7  ;;  %vm1364_vm10 = vweird.f32 %v1357_v7 }
 0x54c   : > { %v2436_v9 = vpop.eup %2435 }
 0x54d   : > { %v1359_v10 = vmul.f32 %v2436_v9, %v1357_v7  ;;  %vm1365_vm9 = vweird.f32 %v2436_v9 }
 0x54e   : > { %vm1366_vm11 = vmor %vm1364_vm10, %vm1365_vm9 }
 0x54f   : > { %v1360_v11 = vmul.f32 %v2436_v9, %v1359_v10 }
 0x551   : > { %v1361_v12 = vmul.f32 0.5, %v1360_v11 }
 0x553   : > { %v1362_v14 = vsub.f32 1.5, %v1361_v12 }
 0x555   : > { %v1363_v16 = vmul.f32 %v2436_v9, %v1362_v14 }
 0x557   : > { %v1367_v18 = vsel %vm1366_vm11, %v2436_v9, %v1363_v16 }
 0x558   : > { %v1368_v20 = vmul.f32 %v1367_v18, %v1351_v3 }
 0x55a   : > { %v1370_v21 = vmul.f32 %v1369_v17, %v1368_v20 }
 0x55c   : > { %v2845_v22 = vadd.f32 %v1371_v19, %v1370_v21 }
 0x55e   : > { %v1373_v23 = vpack.c.bf16 %v2845_v22, %v2845_v22 }
 0x560   : > { %2248 = vmatmul.msk.bf16.vlgmr.msra.gmra.mxu2 %vm988_vm1, %v1373_v23 }
 0x5e3   : > { %v1406_v28 = vpop.f32.mrf.mxu2 }
 0x5e4   : > { %v1407_v29 = vadd.f32 %v2412_v27, %v1406_v28 }
 0x5e6   : > { %v1410_v30 = vpack.c.bf16 %v1407_v29, %v1407_v29 }
 0x5e8   : > { %1411 = vst.msk [vmem:[#allocation3] sm:$0xf] %vm1006_vm2, %v1410_v30  ;;  %1413 = vrot.lane.b32.xlu0 %v1410_v30, %s2498_s22  ;;  %1421 = vrot.lane.b32.xlu1 %v1410_v30, %s2500_s4  ;;  %s3046_s4 = sld [smem:[#allocation20_spill]] }
 0x5eb   : > { %v1408_v31 = vpop.f32.mrf.mxu2 }
 0x5ef   : > { %v1446_v32 = vld [vmem:[#allocation3] sm:$0xf] }
 0x5f0   : > { %1417 = vrot.lane.b32.xlu0 %v1410_v30, %s2501_s1  ;;  %2253 = vmatmul.msk.bf16.vlgmr.msra.gmra.mxu3 %vm1082_vm3, %v1446_v32  ;;  %s3047_s1 = scalar_lea.vmem %s3046_s4, %s3068_s30  ;;  %s3048_s30 = sld [smem:[#allocation13_spill]] }
 0x5f1   : > { %v2413_v53 = vld [vmem:[%s3047_s1] ss:$0 sm:$0xff] }
 0x5f6   : > { %v2286_v28 = vld [vmem:[%s3048_s30 + $0x18] sm:$0xf]  ;;  %v2345_v29 = vld [vmem:[%s3048_s30 + $0x18] sm:$0x30]  ;;  %v2281_v31 = vld [vmem:[%s3048_s30 + $0x10] sm:$0xf] }
 0x5f7   : > { %v2287_v30 = vor.u32 %v2345_v29, %v2286_v28  ;;  %v2344_v32 = vld [vmem:[%s3048_s30 + $0x10] sm:$0x30]  ;;  %v2276_v36 = vld [vmem:[%s3048_s30 + $0x8] sm:$0xf]  ;;  %v2343_v37 = vld [vmem:[%s3048_s30 + $0x8] sm:$0x30] }
 0x5f8   : > { %v2282_v34 = vor.u32 %v2344_v32, %v2281_v31  ;;  %v2277_v38 = vor.u32 %v2343_v37, %v2276_v36  ;;  %v2271_v40 = vld [vmem:[%s3048_s30] sm:$0xf]  ;;  %v2342_v41 = vld [vmem:[%s3048_s30] sm:$0x30]  ;;  %v2349_v29 = vld [vmem:[%s2710_s27 + $0x8] sm:$0xff] }
 0x5f9   : > { %v1680_v33 = vsel %vm1606_vm13, %v2287_v30, 0  ;;  %v2272_v42 = vor.u32 %v2342_v41, %v2271_v40  ;;  %v2348_v30 = vld [vmem:[%s2710_s27] sm:$0xff]  ;;  %v2353_v31 = vld [vmem:[%s3052_s24 + $0x18] sm:$0xff]  ;;  %v1770_v41 = vperm.slane %v2838_v13, 1 }
 0x5fa   : > { %1689 = vmatpush.bf16.msra.mxu2 %v1680_v33  ;;  %v1656_v35 = vsel %vm1606_vm13, %v2282_v34, 0  ;;  %v1632_v39 = vsel %vm1606_vm13, %v2277_v38, 0  ;;  %v2352_v33 = vld [vmem:[%s3052_s24 + $0x10] sm:$0xff] }
 0x5fb   : > { %1665 = vmatpush.bf16.msra.mxu1 %v1656_v35  ;;  %1641 = vmatpush.bf16.msra.mxu0 %v1632_v39  ;;  %v1608_v43 = vsel %vm1606_vm13, %v2272_v42, 0 }
 0x5fc   : > { %1617 = vmatpush.bf16.msrb.mxu3 %v1608_v43  ;;  %v1772_v43 = vperm.slane %v2841_v15, 1 }
 0x65a   : > { %v1414_v45 = vpop.permute.xlu0 %1413  ;;  %v1422_v46 = vpop.permute.xlu1 %1421 }
 0x65b   : > { %1416 = vst.msk [vmem:[#allocation3 + $0x4] sm:$0xf] %vm1006_vm2, %v1414_v45 }
 0x65c   : > { %1424 = vst.msk [vmem:[#allocation3 + $0xc] sm:$0xf] %vm1006_vm2, %v1422_v46 }
 0x662   : > { %v1418_v47 = vpop.permute.xlu0 %1417  ;;  %v1447_v48 = vld [vmem:[#allocation3 + $0x4] sm:$0xf] }
 0x663   : > { %1420 = vst.msk [vmem:[#allocation3 + $0x8] sm:$0xf] %vm1006_vm2, %v1418_v47  ;;  %2258 = vmatmul.msk.bf16.vlgmr.msrb.gmra.mxu0 %vm1082_vm3, %v1447_v48  ;;  %v1449_v49 = vld [vmem:[#allocation3 + $0xc] sm:$0xf] }
 0x664   : > { %2268 = vmatmul.msk.bf16.vlgmr.msrb.gmra.mxu2 %vm1082_vm3, %v1449_v49  ;;  %1804 = vmatpush.bf16.msrb.mxu0 %v2349_v29 }
 0x668   : > { %1805 = vmatpush.bf16.msrb.mxu0 %v2348_v30 }
 0x66a   : > { %v1448_v50 = vld [vmem:[#allocation3 + $0x8] sm:$0xf] }
 0x66b   : > { %2263 = vmatmul.msk.bf16.vlgmr.msrb.gmra.mxu1 %vm1082_vm3, %v1448_v50 }
 0x66c   : > { %1857 = vmatpush.bf16.msrb.mxu1 %v2353_v31 }
 0x670   : > { %1858 = vmatpush.bf16.msrb.mxu1 %v2352_v33 }
 0x673   : > { %v1473_v51 = vpop.f32.mrf.mxu3 }
 0x674   : > { %v1474_v0 = vadd.f32 %v2413_v53, %v1473_v51 }
 0x676   : > { %v1550_v4 = vsel %vm1549_vm12, %v1474_v0, -inf }
 0x67b   : > { %v1475_v52 = vpop.f32.mrf.mxu3 }
 0x6e0   : > { %v1497_v54 = vpop.f32.mrf.mxu0 }
 0x6e1   : > { %v1498_v55 = vadd.f32 %v2413_v53, %v1497_v54 }
 0x6e3   : > { %v1553_v56 = vsel %vm1549_vm12, %v1498_v55, -inf }
 0x6e4   : > { %1554 = vmax.xlane.f32.xlu0 %v1553_v56 }
 0x6e7   : > { %v1545_v57 = vpop.f32.mrf.mxu2 }
 0x6e8   : > { %v1546_v58 = vadd.f32 %v2413_v53, %v1545_v57  ;;  %v1499_v59 = vpop.f32.mrf.mxu0  ;;  %v1521_v60 = vpop.f32.mrf.mxu1 }
 0x6e9   : > { %v1522_v62 = vadd.f32 %v2413_v53, %v1521_v60 }
 0x6ea   : > { %v1559_v63 = vsel %vm1549_vm12, %v1546_v58, -inf }
 0x6eb   : > { %1560 = vmax.xlane.f32.xlu1 %v1559_v63  ;;  %v1556_v3 = vsel %vm1549_vm12, %v1522_v62, -inf }
 0x6ec   : > { %1557 = vmax.xlane.f32.xlu2 %v1556_v3 }
 0x6ef   : > { %v1547_v1 = vpop.f32.mrf.mxu2 }
 0x6f0   : > { %v1523_v2 = vpop.f32.mrf.mxu1 }
 0x6f4   : > { %1551 = vmax.xlane.f32.xlu2 %v1550_v4 }
 0x757   : > { %v1555_v5 = vpop.xlane.xlu0 %1554 }
 0x758   : > { %v1563_v11 = vsub.f32 %v1498_v55, %v1555_v5 }
 0x75a   : > { %v1568_v16 = vmul.f32 1.442695, %v1563_v11  ;;  %v2346_v11 = vld [vmem:[%s3049_s19] sm:$0xff] }
 0x75e   : > { %v1561_v6 = vpop.xlane.xlu1 %1560 }
 0x75f   : > { %v1565_v7 = vsub.f32 %v1546_v58, %v1561_v6  ;;  %v1558_v9 = vpop.xlane.xlu2 %1557 }
 0x760   : > { %v1564_v10 = vsub.f32 %v1522_v62, %v1558_v9 }
 0x761   : > { %v1572_v12 = vmul.f32 1.442695, %v1565_v7 }
 0x762   : > { %v1570_v14 = vmul.f32 1.442695, %v1564_v10  ;;  %v2347_v10 = vld [vmem:[%s3049_s19 + $0x8] sm:$0xff] }
 0x763   : > { %2437 = vpow2.f32 %v1572_v12  ;;  %1740 = vmatpush.bf16.msra.mxu3 %v2347_v10 }
 0x764   : > { %2439 = vpow2.f32 %v1570_v14 }
 0x765   : > { %2441 = vpow2.f32 %v1568_v16 }
 0x767   : > { %v1552_v17 = vpop.xlane.xlu2 %1551  ;;  %1741 = vmatpush.bf16.msra.mxu3 %v2346_v11 }
 0x768   : > { %v1562_v19 = vsub.f32 %v1474_v0, %v1552_v17 }
 0x769   : > { %v2438_v18 = vpop.eup %2437 }
 0x76a   : > { %v2440_v20 = vpop.eup %2439  ;;  %v1583_v21 = vsel %vm1549_vm12, %v2438_v18, 0.0  ;;  %v1566_v8 = vmul.f32 1.442695, %v1562_v19 }
 0x76b   : > { %1584 = vadd.xlane.f32.xlu2 %v1583_v21  ;;  %v1580_v23 = vsel %vm1549_vm12, %v2440_v20, 0.0  ;;  %v2442_v24 = vpop.eup %2441 }
 0x76c   : > { %1581 = vadd.xlane.f32.xlu1 %v1580_v23  ;;  %2443 = vpow2.f32 %v1566_v8  ;;  %v1577_v25 = vsel %vm1549_vm12, %v2442_v24, 0.0 }
 0x772   : > { %v2444_v26 = vpop.eup %2443 }
 0x773   : > { %1578 = vadd.xlane.f32.xlu2 %v1577_v25  ;;  %v1574_v27 = vsel %vm1549_vm12, %v2444_v26, 0.0 }
 0x77b   : > { %1575 = vadd.xlane.f32.xlu2 %v1574_v27 }
 0x7de   : > { %v1585_v44 = vpop.xlane.xlu2 %1584 }
 0x7df   : > { %2445 = vrcp.f32 %v1585_v44  ;;  %v1582_v45 = vpop.xlane.xlu1 %1581 }
 0x7e0   : > { %2447 = vrcp.f32 %v1582_v45 }
 0x7e5   : > { %v2446_v46 = vpop.eup %2445 }
 0x7e6   : > { %v2448_v47 = vpop.eup %2447  ;;  %v1593_v48 = vmul.f32 %v2446_v46, %v2438_v18  ;;  %v1579_v49 = vpop.xlane.xlu2 %1578  ;;  %v2414_v18 = vld [vmem:[%s3051_s26] ss:$0 sm:$0xff] }
 0x7e7   : > { %v1592_v50 = vmul.f32 %v2448_v47, %v2440_v20  ;;  %2449 = vrcp.f32 %v1579_v49  ;;  %v2350_v49 = vld [vmem:[%s3052_s24] sm:$0xff] }
 0x7e8   : > { %v1597_v51 = vpack.c.bf16 %v1593_v48, %v1593_v48  ;;  %v2351_v48 = vld [vmem:[%s3052_s24 + $0x8] sm:$0xff] }
 0x7e9   : > { %v1596_v52 = vpack.c.bf16 %v1592_v50, %v1592_v50  ;;  %1859 = vmatpush.bf16.msrb.mxu1 %v2351_v48  ;;  %v2415_v50 = vld [vmem:[%s3054_s29] ss:$0 sm:$0xff] }
 0x7ea   : > { %2288 = vmatmul.msk.bf16.vlgmr.msra.gmra.mxu2 %vm1549_vm12, %v1597_v51 }
 0x7eb   : > { %2283 = vmatmul.msk.bf16.vlgmr.msra.gmra.mxu1 %vm1549_vm12, %v1596_v52 }
 0x7ed   : > { %v2450_v53 = vpop.eup %2449  ;;  %1860 = vmatpush.bf16.msrb.mxu1 %v2350_v49 }
 0x7ee   : > { %v1591_v54 = vmul.f32 %v2450_v53, %v2442_v24  ;;  %v1576_v55 = vpop.xlane.xlu2 %1575 }
 0x7ef   : > { %2451 = vrcp.f32 %v1576_v55 }
 0x7f0   : > { %v1595_v56 = vpack.c.bf16 %v1591_v54, %v1591_v54 }
 0x7f2   : > { %2278 = vmatmul.msk.bf16.vlgmr.msra.gmra.mxu0 %vm1549_vm12, %v1595_v56  ;;  %v2416_v56 = vld [vmem:[%s937_s20] ss:$0 sm:$0xff] }
 0x7f5   : > { %v2452_v57 = vpop.eup %2451 }
 0x7f6   : > { %v1590_v58 = vmul.f32 %v2452_v57, %v2444_v26 }
 0x7f8   : > { %v1594_v59 = vpack.c.bf16 %v1590_v58, %v1590_v58 }
 0x7fa   : > { %2273 = vmatmul.msk.bf16.vlgmr.msrb.gmra.mxu3 %vm1549_vm12, %v1594_v59 }
 0x868   : > { %v1667_v60 = vpop.f32.mrf.mxu1 }
 0x869   : > { %v1703_v62 = vpack.c.bf16 %v1667_v60, %v1667_v60 }
 0x86b   : > { %1705 = vrot.lane.b32.xlu1 %v1703_v62, %s2509_s12 }
 0x86d   : > { %v1691_v63 = vpop.f32.mrf.mxu2 }
 0x86e   : > { %v1709_v3 = vpack.c.bf16 %v1691_v63, %v1691_v63 }
 0x86f   : > { %v1643_v0 = vpop.f32.mrf.mxu0 }
 0x870   : > { %v1697_v1 = vpack.c.bf16 %v1643_v0, %v1643_v0  ;;  %1711 = vrot.lane.b32.xlu2 %v1709_v3, %s2510_s13  ;;  %v1669_v2 = vpop.f32.mrf.mxu1 }
 0x872   : > { %1699 = vrot.lane.b32.xlu0 %v1697_v1, %s2508_s7 }
 0x875   : > { %v1693_v4 = vpop.f32.mrf.mxu2 }
 0x877   : > { %v1645_v5 = vpop.f32.mrf.mxu0 }
 0x87d   : > { %v1619_v6 = vpop.f32.mrf.mxu3 }
 0x87e   : > { %v1695_v7 = vpack.c.bf16 %v1619_v6, %v1619_v6 }
 0x880   : > { %1696 = vst.msk [vmem:[#allocation6] sm:$0xf] %vm1006_vm2, %v1695_v7  ;;  %vm1849_vm2 = vcmask 523264  }
 0x885   : > { %v1621_v9 = vpop.f32.mrf.mxu3 }
 0x8ca   : > { %v1712_v16 = vpop.permute.xlu2 %1711 }
 0x8dd   : > { %v1706_v14 = vpop.permute.xlu1 %1705 }
 0x8e4   : > { %v1700_v12 = vpop.permute.xlu0 %1699 }
 0x8e5   : > { %1702 = vst.msk [vmem:[#allocation6] sm:$0xf] %vm1291_vm5, %v1700_v12 }
 0x8e6   : > { %1708 = vst.msk [vmem:[#allocation6] sm:$0xf] %vm1298_vm6, %v1706_v14 }
 0x8e7   : > { %1714 = vst.msk [vmem:[#allocation6] sm:$0xf] %vm1305_vm7, %v1712_v16  ;;  %v1889_v16 = vperm.slane %v2838_v13, 2 }
 0x8ee   : > { %v1715_v17 = vld [vmem:[#allocation6] sm:$0xf] }
 0x8ef   : > { %2297 = vmatmul.msk.bf16.vlgmr.msra.gmra.mxu3 %vm988_vm1, %v1715_v17 }
 0x972   : > { %v1743_v19 = vpop.f32.mrf.mxu3 }
 0x973   : > { %v1744_v20 = vadd.f32 %v2414_v18, %v1743_v19  ;;  %v1891_v18 = vperm.slane %v2841_v15, 2 }
 0x975   : > { %v1747_v21 = vadd.f32 %v1744_v20, %v2845_v22 }
 0x977   : > { %v1748_v23 = vsel %vm988_vm1, %v1747_v21, 0.0 }
 0x978   : > { %1749 = vadd.xlane.f32.xlu0 %v1748_v23 }
 0x97a   : > { %v1745_v8 = vpop.f32.mrf.mxu3 }
 0x9eb   : > { %v1750_v24 = vpop.xlane.xlu0 %1749 }
 0x9ec   : > { %v1751_v25 = vmul.f32 %v1750_v24, %v2830_v61 }
 0x9ee   : > { %v1752_v26 = vsub.f32 %v1747_v21, %v1751_v25 }
 0x9f0   : > { %v1753_v27 = vmul.f32 %v1752_v26, %v1752_v26 }
 0x9f2   : > { %v1754_v28 = vsel %vm988_vm1, %v1753_v27, 0.0 }
 0x9f3   : > { %1755 = vadd.xlane.f32.xlu1 %v1754_v28 }
 0xa66   : > { %v1756_v32 = vpop.xlane.xlu1 %1755 }
 0xa67   : > { %v1757_v22 = vmul.f32 %v1756_v32, %v2830_v61 }
 0xa69   : > { %v1758_v34 = vadd.f32 1e-05, %v1757_v22 }
 0xa6b   : > { %2453 = vrsqrt.f32 %v1758_v34  ;;  %vm1765_vm15 = vweird.f32 %v1758_v34 }
 0xa71   : > { %v2454_v35 = vpop.eup %2453 }
 0xa72   : > { %v1760_v36 = vmul.f32 %v2454_v35, %v1758_v34  ;;  %vm1766_vm14 = vweird.f32 %v2454_v35 }
 0xa73   : > { %vm1767_vm0 = vmor %vm1765_vm15, %vm1766_vm14 }
 0xa74   : > { %v1761_v37 = vmul.f32 %v2454_v35, %v1760_v36 }
 0xa76   : > { %v1762_v38 = vmul.f32 0.5, %v1761_v37 }
 0xa78   : > { %v1763_v39 = vsub.f32 1.5, %v1762_v38 }
 0xa7a   : > { %v1764_v40 = vmul.f32 %v2454_v35, %v1763_v39 }
 0xa7c   : > { %v1768_v42 = vsel %vm1767_vm0, %v2454_v35, %v1764_v40 }
 0xa7d   : > { %v1769_v44 = vmul.f32 %v1768_v42, %v1752_v26 }
 0xa7f   : > { %v1771_v45 = vmul.f32 %v1770_v41, %v1769_v44 }
 0xa81   : > { %v1773_v46 = vadd.f32 %v1772_v43, %v1771_v45 }
 0xa83   : > { %v1774_v47 = vpack.c.bf16 %v1773_v46, %v1773_v46 }
 0xa85   : > { %2306 = vmatmul.msk.bf16.vlgmr.msrb.gmra.mxu0 %vm988_vm1, %v1774_v47 }
 0xb02   : > { %v1807_v51 = vpop.f32.mrf.mxu0 }
 0xb03   : > { %v1808_v52 = vadd.f32 %v2415_v50, %v1807_v51 }
 0xb05   : > { %v1811_v53 = vmax.f32 %v1808_v52, 0.0 }
 0xb07   : > { %v1812_v54 = vpack.c.bf16 %v1811_v53, %v1811_v53 }
 0xb09   : > { %2323 = vmatmul.msk.bf16.vlgmr.msrb.gmra.mxu1 %vm1849_vm2, %v1812_v54 }
 0xb0a   : > { %v1809_v55 = vpop.f32.mrf.mxu0 }
 0xb86   : > { %v1862_v57 = vpop.f32.mrf.mxu1 }
 0xb87   : > { %v1863_v58 = vadd.f32 %v2416_v56, %v1862_v57 }
 0xb89   : > { %v1866_v59 = vadd.f32 %v1863_v58, %v1773_v46 }
 0xb8b   : > { %v1867_v60 = vsel %vm988_vm1, %v1866_v59, 0.0 }
 0xb8c   : > { %1868 = vadd.xlane.f32.xlu2 %v1867_v60 }
 0xb8e   : > { %v1864_v62 = vpop.f32.mrf.mxu1 }
 0xbff   : > { %v1869_v63 = vpop.xlane.xlu2 %1868 }
 0xc00   : > { %v1870_v3 = vmul.f32 %v1869_v63, %v2830_v61 }
 0xc02   : > { %v1871_v0 = vsub.f32 %v1866_v59, %v1870_v3 }
 0xc04   : > { %v1872_v1 = vmul.f32 %v1871_v0, %v1871_v0 }
 0xc06   : > { %v1873_v2 = vsel %vm988_vm1, %v1872_v1, 0.0 }
 0xc07   : > { %1874 = vadd.xlane.f32.xlu0 %v1873_v2 }
 0xc7a   : > { %v1875_v4 = vpop.xlane.xlu0 %1874 }
 0xc7b   : > { %v1876_v5 = vmul.f32 %v1875_v4, %v2830_v61 }
 0xc7d   : > { %v1877_v6 = vadd.f32 1e-05, %v1876_v5 }
 0xc7f   : > { %2455 = vrsqrt.f32 %v1877_v6  ;;  %vm1884_vm4 = vweird.f32 %v1877_v6 }
 0xc85   : > { %v2456_v7 = vpop.eup %2455 }
 0xc86   : > { %v1879_v9 = vmul.f32 %v2456_v7, %v1877_v6  ;;  %vm1885_vm3 = vweird.f32 %v2456_v7 }
 0xc87   : > { %vm1886_vm5 = vmor %vm1884_vm4, %vm1885_vm3 }
 0xc88   : > { %v1880_v10 = vmul.f32 %v2456_v7, %v1879_v9 }
 0xc8a   : > { %v1881_v11 = vmul.f32 0.5, %v1880_v10 }
 0xc8c   : > { %v1882_v12 = vsub.f32 1.5, %v1881_v11 }
 0xc8e   : > { %v1883_v14 = vmul.f32 %v2456_v7, %v1882_v12 }
 0xc90   : > { %v1887_v17 = vsel %vm1886_vm5, %v2456_v7, %v1883_v14 }
 0xc91   : > { %v1888_v19 = vmul.f32 %v1887_v17, %v1871_v0 }
 0xc93   : > { %v1890_v20 = vmul.f32 %v1889_v16, %v1888_v19 }
 0xc95   : > { %v1892_v61 = vadd.f32 %v1891_v18, %v1890_v20 }
 0xc97   : > { %1893 = vst.msk [vmem:[#allocation2] sm:$0xff] %vm988_vm1, %v1892_v61 }
 0xc98   : > { %1894 = vst.msk [vmem:[%s2742_s0] sm:$0xff] %vm988_vm1, %v1892_v61 }
 0xc99 PF: > { %s3056_s23 = sld [smem:[#allocation10_spill]] }
 0xc9a   : > { %s3057_s0 = sld [smem:[#allocation8_spill]] }
 0xc9b   : > { %s3058_s30 = sld [smem:[#allocation9_spill]] }
 0xc9c   : > { %s3059_s20 = sld [smem:[#allocation11_spill]] }
 0xc9d   : > { %s3060_s21 = sld [smem:[#allocation12_spill]] }
 0xc9f   : > { %s29_s1 = sadd.s32 1, %s3056_s23  }
 0xca0   : > { %p26_p8 = scmp.ge.s32.totalorder %s29_s1, 6  }
 0xca2   :  { %28 = sbr.rel (!%p26_p8) target bundleno = 18 (0x12), region = 193 }

</bundles_post_ra>
